<compile_context>
chip_gen: v5e
topology: v5e:2x2
jax: 0.10.0
libtpu: 0.0.40
codegen_flags: <defaults>
</compile_context>

<pallas_src>
import functools
import math

import jax
import jax.numpy as jnp
from jax.experimental import pallas as pl
from jax.experimental.pallas import tpu as pltpu


# ------------------------------- kernel --------------------------------------

def fused_graph_kernel(xq_ref, xk_ref, m_ref, c_ref, logphi_ref, adj_ref, *,
                       n_valid_k):
    # xq: (tm, D) row tile of queries (f32); xk: (Nkp, D) full (padded) keys,
    # already cast to the matmul dtype in the wrapper; m: (D, D) folded
    # projection; c: (1, Nkp) key-only bias; logphi: scalar in SMEM.
    qm = jnp.dot(xq_ref[...], m_ref[...],
                 preferred_element_type=jnp.float32)            # (tm, D)

    # scores[i, j] = <qm[i, :], xk[j, :]> + c[j]   -> (tm, Nkp)
    scores = jax.lax.dot_general(
        qm.astype(xk_ref.dtype), xk_ref[...],
        (((1,), (1,)), ((), ())),
        preferred_element_type=jnp.float32,
    ) + c_ref[...]

    # Mask padded key columns (compile-time branch; no-op when N % 128 == 0).
    if n_valid_k != scores.shape[-1]:
        col = jax.lax.broadcasted_iota(jnp.int32, scores.shape, 1)
        scores = jnp.where(col < n_valid_k, scores, -jnp.inf)

    # Log-space threshold:  softmax(scores)[i,j] >= phi
    #   <=>  scores[i,j] >= row_max + log(phi) + log(sum_j exp(scores - row_max))
    # (the exp() temporary dies at the row sum; compare reuses live scores).
    row_max = jnp.max(scores, axis=-1, keepdims=True)
    log_sum = jnp.log(jnp.sum(jnp.exp(scores - row_max), axis=-1, keepdims=True))
    thr = row_max + logphi_ref[0] + log_sum
    adj_ref[...] = jnp.where(scores >= thr, 1.0, 0.0).astype(adj_ref.dtype)


# ------------------------------ wrapper ---------------------------------------

def graph_constructor(xq, xk, params, *, h, tm=128,
                      out_dtype=jnp.float32, matmul_dtype=jnp.float32,
                      single_buffer_constants=True, vmem_limit_bytes=None):
    """Fused GraphConstructor forward.

    tm: row-tile size.  Keep >= 2 grid steps (tm <= N/2) so v7x's two
        TensorCores both get work (>= 4 steps for load balance); at large N
        raise tm to 256-512 on v5e/v6e (with vmem_limit_bytes above the
        16/32 MiB default scoped limits) and re-derive against v7x's 64 MiB:
        budget ~ 2*tm*nk_pad*out_bytes (output double buffer)
               + nk_pad*D*in_bytes    (resident keys, single-buffered)
               + tm*nk_pad*4          (f32 scores temporary).
    out_dtype: float32 matches the torch module; bfloat16/int8 are exact (0/1
        values) and cut the dominant N^2 HBM store traffic 2-4x.
    matmul_dtype: set to jnp.bfloat16 on v6e/v7x for large N (keys are cast
        once in the wrapper; f32 accumulation kept via preferred_element_type).
        Re-validate thresholds before enabling — adj is a hard compare.
    """
    N, D = xq.shape
    assert D % h == 0
    d_k = D // h

    # Fold Wo head weights (feature f belongs to head f // d_k) and 1/sqrt(d_k)
    # into the Q projection, then fold both Linears into one (D, D) matrix.
    scale = (jnp.repeat(params["wo_w"].reshape(h), d_k) /
             math.sqrt(d_k)).astype(jnp.float32)                     # (D,)
    w1s = params["w1"].T.astype(jnp.float32) * scale[None, :]        # (D, D)
    b1s = params["b1"].astype(jnp.float32) * scale                   # (D,)
    w2t = params["w2"].T.astype(jnp.float32)                         # (D, D)
    # b2-dependent term, Wo bias: per-row / constant shifts -> no-ops under the
    # row softmax, dropped.  The key-only bias term survives as c below.
    m_mat = w1s @ w2t.T                                              # (D, D)
    c = xk.astype(jnp.float32) @ (w2t @ b1s)                         # (N,)

    phi = params["phi"].astype(jnp.float32)
    # log(phi) computed once here; phi <= 0 means "every entry passes".
    log_phi = jnp.where(phi > 0, jnp.log(phi), -jnp.inf).reshape(1)

    # Pad rows to a multiple of tm and keys to a multiple of 128 so the
    # (tm, Nkp) adjacency store stays an unmasked lane-dense vst and no rows
    # are silently truncated when N % tm != 0.
    nq_pad = pl.cdiv(N, tm) * tm
    nk_pad = pl.cdiv(N, 128) * 128
    xq_p = xq.astype(jnp.float32)
    if nq_pad != N:
        xq_p = jnp.pad(xq_p, ((0, nq_pad - N), (0, 0)))
    xk_p = xk.astype(matmul_dtype)       # cast ONCE here, not per grid step
    c_p = c.reshape(1, N)
    if nk_pad != N:
        xk_p = jnp.pad(xk_p, ((0, nk_pad - N), (0, 0)))
        c_p = jnp.pad(c_p, ((0, 0), (0, nk_pad - N)))

    kernel = functools.partial(fused_graph_kernel, n_valid_k=N)

    def run(use_single_buffer):
        # Constant-index inputs (fetched once) -> single buffer to free VMEM.
        const_kw = ({"pipeline_mode": pl.Buffered(1)}
                    if use_single_buffer else {})
        in_specs = [
            pl.BlockSpec((tm, D), lambda i: (i, 0)),                  # xq tile
            pl.BlockSpec((nk_pad, D), lambda i: (0, 0), **const_kw),  # keys
            pl.BlockSpec((D, D), lambda i: (0, 0), **const_kw),       # M
            pl.BlockSpec((1, nk_pad), lambda i: (0, 0), **const_kw),  # c
            pl.BlockSpec(memory_space=pltpu.MemorySpace.SMEM),        # log(phi)
        ]
        return pl.pallas_call(
            kernel,
            out_shape=jax.ShapeDtypeStruct((nq_pad, nk_pad), out_dtype),
            grid=(nq_pad // tm,),
            in_specs=in_specs,
            out_specs=pl.BlockSpec((tm, nk_pad), lambda i: (i, 0)),
            compiler_params=pltpu.CompilerParams(
                dimension_semantics=("parallel",),
                vmem_limit_bytes=vmem_limit_bytes),
        )(xq_p, xk_p, m_mat, c_p, log_phi)

    if single_buffer_constants:
        try:
            adj_p = run(True)
        except Exception:
            # Older jax versions may reject Buffered(1); double-buffered
            # constants are correct, just slightly more VMEM.
            adj_p = run(False)
    else:
        adj_p = run(False)

    if (nq_pad, nk_pad) != (N, N):
        adj_p = adj_p[:N, :N]
    return adj_p


# --------------------------- pure-JAX reference --------------------------------

def reference(xq, xk, params, *, h):
    N, D = xq.shape
    d_k = D // h
    q = xq @ params["w1"].T + params["b1"]
    k = xk @ params["w2"].T + params["b2"]
    qh = q.reshape(N, h, d_k)
    kh = k.reshape(N, h, d_k)
    scores = jnp.einsum("ihd,jhd->hij", qh, kh) / math.sqrt(d_k)      # (h, N, N)
    scores = jnp.einsum("hij,h->ij", scores, params["wo_w"].reshape(h)) \
        + params["wo_b"].reshape(())
    p = jax.nn.softmax(scores, axis=1)
    return jnp.where(p >= params["phi"], 1.0, 0.0)


# --------------------------------- main ----------------------------------------

if __name__ == "__main__":
    N, D, H = 256, 32, 4          # N cells, input_dim=32, h=4 heads -> d_k=8
    key = jax.random.PRNGKey(0)
    ks = jax.random.split(key, 8)

    xq = jax.random.normal(ks[0], (N, D), jnp.float32)
    xk = jax.random.normal(ks[1], (N, D), jnp.float32)

    params = {
        "w1": jax.random.normal(ks[2], (D, D), jnp.float32) / math.sqrt(D),
        "b1": 0.1 * jax.random.normal(ks[3], (D,), jnp.float32),
        "w2": jax.random.normal(ks[4], (D, D), jnp.float32) / math.sqrt(D),
        "b2": 0.1 * jax.random.normal(ks[5], (D,), jnp.float32),
        "wo_w": 0.5 * jax.random.normal(ks[6], (1, H), jnp.float32),   # Linear(h, 1).weight
        "wo_b": 0.1 * jax.random.normal(ks[7], (1,), jnp.float32),     # Linear(h, 1).bias
        "phi": jnp.float32(1.0 / N),                                   # learnable scalar
    }

    ref = reference(xq, xk, params, h=H)

    # Default path: f32 adjacency (matches the torch module exactly).
    # tm=128 -> 2 parallel grid steps at N=256 (keeps both v7x TCs busy).
    adj = graph_constructor(xq, xk, params, h=H, tm=128)
    adj = jax.block_until_ready(adj)
    assert adj.shape == (N, N)
    assert adj.dtype == jnp.float32
    # Thresholding near phi can flip under fp reassociation; allow a tiny fraction.
    mismatch = float(jnp.mean(jnp.abs(adj - ref)))
    assert mismatch < 1e-3, f"adjacency mismatch fraction {mismatch}"

    # Narrow-output path (perf feedback): bf16 adjacency is exactly 0/1 and
    # halves the N^2 HBM store traffic / output VMEM double-buffer.
    adj_bf16 = graph_constructor(xq, xk, params, h=H, tm=128,
                                 out_dtype=jnp.bfloat16)
    adj_bf16 = jax.block_until_ready(adj_bf16)
    mismatch_bf16 = float(jnp.mean(jnp.abs(adj_bf16.astype(jnp.float32) - ref)))
    assert mismatch_bf16 < 1e-3, f"bf16 adjacency mismatch {mismatch_bf16}"

    print("KERNEL_OK")
</pallas_src>

<mosaic_0001>
module attributes {stable_mosaic.version = 11 : i64} {
  func.func @fused_graph_kernel(%arg0: i32, %arg1: memref<128x32xf32, #tpu.memory_space<vmem>>, %arg2: memref<256x32xf32, #tpu.memory_space<vmem>>, %arg3: memref<32x32xf32, #tpu.memory_space<vmem>>, %arg4: memref<1x256xf32, #tpu.memory_space<vmem>>, %arg5: memref<1xf32, #tpu.memory_space<smem>>, %arg6: memref<128x256xf32, #tpu.memory_space<vmem>>) attributes {dimension_semantics = [#tpu.dimension_semantics<parallel>], iteration_bounds = array<i64: 2>, scalar_prefetch = 0 : i64, scratch_operands = 0 : i64, tpu.core_type = #tpu.core_type<tc>, window_params = [{transform_indices = @transform_0, window_bounds = array<i64: 128, 32>}, {pipeline_mode = #tpu.pipeline_mode<synchronous>, transform_indices = @transform_1, window_bounds = array<i64: 256, 32>}, {pipeline_mode = #tpu.pipeline_mode<synchronous>, transform_indices = @transform_2, window_bounds = array<i64: 32, 32>}, {pipeline_mode = #tpu.pipeline_mode<synchronous>, transform_indices = @transform_3, window_bounds = array<i64: 1, 256>}, {transform_indices = @transform_4, window_bounds = array<i64: 1>}, {transform_indices = @transform_5, window_bounds = array<i64: 128, 256>}]} {
    %c0 = arith.constant 0 : index
    %c0_0 = arith.constant 0 : index
    %0 = vector.load %arg1[%c0, %c0_0] : memref<128x32xf32, #tpu.memory_space<vmem>>, vector<128x32xf32>
    %c0_1 = arith.constant 0 : index
    %c0_2 = arith.constant 0 : index
    %1 = vector.load %arg3[%c0_1, %c0_2] : memref<32x32xf32, #tpu.memory_space<vmem>>, vector<32x32xf32>
    %cst = arith.constant dense<0.000000e+00> : vector<128x32xf32>
    %2 = tpu.matmul %0, %1, %cst {dimension_numbers = #tpu.dot_dimension_numbers<[1], [0], [0], [1], [0, 0, 1, 1], [], []>} : vector<128x32xf32>, vector<32x32xf32>, vector<128x32xf32> -> vector<128x32xf32>
    %c0_3 = arith.constant 0 : index
    %c0_4 = arith.constant 0 : index
    %3 = vector.load %arg2[%c0_3, %c0_4] : memref<256x32xf32, #tpu.memory_space<vmem>>, vector<256x32xf32>
    %cst_5 = arith.constant dense<0.000000e+00> : vector<128x256xf32>
    %4 = tpu.matmul %2, %3, %cst_5 {dimension_numbers = #tpu.dot_dimension_numbers<[1], [1], [0], [0], [0, 0, 1, 0], [], []>} : vector<128x32xf32>, vector<256x32xf32>, vector<128x256xf32> -> vector<128x256xf32>
    %c0_6 = arith.constant 0 : index
    %c0_7 = arith.constant 0 : index
    %5 = vector.load %arg4[%c0_6, %c0_7] : memref<1x256xf32, #tpu.memory_space<vmem>>, vector<1x256xf32>
    %6 = vector.broadcast %5 : vector<1x256xf32> to vector<128x256xf32>
    %7 = arith.addf %4, %6 : vector<128x256xf32>
    %cst_8 = arith.constant dense<0xFF800000> : vector<128xf32>
    %8 = vector.multi_reduction <maximumf>, %7, %cst_8 [1] : vector<128x256xf32> to vector<128xf32>
    %9 = vector.shape_cast %8 : vector<128xf32> to vector<128x1xf32>
    %10 = vector.broadcast %9 : vector<128x1xf32> to vector<128x256xf32>
    %11 = arith.subf %7, %10 : vector<128x256xf32>
    %12 = math.exp %11 : vector<128x256xf32>
    %cst_9 = arith.constant dense<0.000000e+00> : vector<128xf32>
    %13 = vector.multi_reduction <add>, %12, %cst_9 [1] : vector<128x256xf32> to vector<128xf32>
    %14 = vector.shape_cast %13 : vector<128xf32> to vector<128x1xf32>
    %15 = math.log %14 : vector<128x1xf32>
    %c0_10 = arith.constant 0 : index
    %16 = memref.load %arg5[%c0_10] : memref<1xf32, #tpu.memory_space<smem>>
    %17 = vector.broadcast %16 : f32 to vector<128x1xf32>
    %18 = arith.addf %9, %17 : vector<128x1xf32>
    %19 = arith.addf %18, %15 : vector<128x1xf32>
    %20 = vector.broadcast %19 : vector<128x1xf32> to vector<128x256xf32>
    %21 = arith.cmpf oge, %7, %20 : vector<128x256xf32>
    %cst_11 = arith.constant 1.000000e+00 : f32
    %cst_12 = arith.constant 0.000000e+00 : f32
    %22 = vector.broadcast %cst_11 : f32 to vector<128x256xf32>
    %23 = vector.broadcast %cst_12 : f32 to vector<128x256xf32>
    %24 = arith.select %21, %22, %23 : vector<128x256xi1>, vector<128x256xf32>
    %c0_13 = arith.constant 0 : index
    %c0_14 = arith.constant 0 : index
    %25 = vector.load %arg6[%c0_13, %c0_14] : memref<128x256xf32, #tpu.memory_space<vmem>>, vector<128x256xf32>
    tpu.vector_store %arg6[%c0_13, %c0_14], %24 {strides = array<i32>} : memref<128x256xf32, #tpu.memory_space<vmem>>, vector<128x256xf32>,
    return
  }
  func.func @transform_0(%arg0: i32) -> (i32, i32) {
    %c0_i32 = arith.constant 0 : i32
    %c0_i32_0 = arith.constant 0 : i32
    return %arg0, %c0_i32 : i32, i32
  }
  func.func @transform_1(%arg0: i32) -> (i32, i32) {
    %c0_i32 = arith.constant 0 : i32
    %c0_i32_0 = arith.constant 0 : i32
    %c0_i32_1 = arith.constant 0 : i32
    return %c0_i32, %c0_i32_0 : i32, i32
  }
  func.func @transform_2(%arg0: i32) -> (i32, i32) {
    %c0_i32 = arith.constant 0 : i32
    %c0_i32_0 = arith.constant 0 : i32
    %c0_i32_1 = arith.constant 0 : i32
    return %c0_i32, %c0_i32_0 : i32, i32
  }
  func.func @transform_3(%arg0: i32) -> (i32, i32) {
    %c0_i32 = arith.constant 0 : i32
    %c0_i32_0 = arith.constant 0 : i32
    %c0_i32_1 = arith.constant 0 : i32
    return %c0_i32, %c0_i32_0 : i32, i32
  }
  func.func @transform_4(%arg0: i32) -> i32 {
    %c0_i32 = arith.constant 0 : i32
    %c0_i32_0 = arith.constant 0 : i32
    return %c0_i32 : i32
  }
  func.func @transform_5(%arg0: i32) -> (i32, i32) {
    %c0_i32 = arith.constant 0 : i32
    %c0_i32_0 = arith.constant 0 : i32
    return %arg0, %c0_i32 : i32, i32
  }
}

module attributes {stable_mosaic.version = 11 : i64} {
  func.func @fused_graph_kernel(%arg0: i32, %arg1: memref<128x32xf32, #tpu.memory_space<vmem>>, %arg2: memref<256x32xf32, #tpu.memory_space<vmem>>, %arg3: memref<32x32xf32, #tpu.memory_space<vmem>>, %arg4: memref<1x256xf32, #tpu.memory_space<vmem>>, %arg5: memref<1xf32, #tpu.memory_space<smem>>, %arg6: memref<128x256xf32, #tpu.memory_space<vmem>>) attributes {dimension_semantics = [#tpu.dimension_semantics<parallel>], iteration_bounds = array<i64: 2>, scalar_prefetch = 0 : i64, scratch_operands = 0 : i64, tpu.core_type = #tpu.core_type<tc>, window_params = [{transform_indices = @transform_0, window_bounds = array<i64: 128, 32>}, {pipeline_mode = #tpu.pipeline_mode<synchronous>, transform_indices = @transform_1, window_bounds = array<i64: 256, 32>}, {pipeline_mode = #tpu.pipeline_mode<synchronous>, transform_indices = @transform_2, window_bounds = array<i64: 32, 32>}, {pipeline_mode = #tpu.pipeline_mode<synchronous>, transform_indices = @transform_3, window_bounds = array<i64: 1, 256>}, {transform_indices = @transform_4, window_bounds = array<i64: 1>}, {transform_indices = @transform_5, window_bounds = array<i64: 128, 256>}]} {
    %c0 = arith.constant 0 : index
    %c0_0 = arith.constant 0 : index
    %0 = vector.load %arg1[%c0, %c0_0] : memref<128x32xf32, #tpu.memory_space<vmem>>, vector<128x32xf32>
    %c0_1 = arith.constant 0 : index
    %c0_2 = arith.constant 0 : index
    %1 = vector.load %arg3[%c0_1, %c0_2] : memref<32x32xf32, #tpu.memory_space<vmem>>, vector<32x32xf32>
    %cst = arith.constant dense<0.000000e+00> : vector<128x32xf32>
    %2 = tpu.matmul %0, %1, %cst {dimension_numbers = #tpu.dot_dimension_numbers<[1], [0], [0], [1], [0, 0, 1, 1], [], []>} : vector<128x32xf32>, vector<32x32xf32>, vector<128x32xf32> -> vector<128x32xf32>
    %c0_3 = arith.constant 0 : index
    %c0_4 = arith.constant 0 : index
    %3 = vector.load %arg2[%c0_3, %c0_4] : memref<256x32xf32, #tpu.memory_space<vmem>>, vector<256x32xf32>
    %cst_5 = arith.constant dense<0.000000e+00> : vector<128x256xf32>
    %4 = tpu.matmul %2, %3, %cst_5 {dimension_numbers = #tpu.dot_dimension_numbers<[1], [1], [0], [0], [0, 0, 1, 0], [], []>} : vector<128x32xf32>, vector<256x32xf32>, vector<128x256xf32> -> vector<128x256xf32>
    %c0_6 = arith.constant 0 : index
    %c0_7 = arith.constant 0 : index
    %5 = vector.load %arg4[%c0_6, %c0_7] : memref<1x256xf32, #tpu.memory_space<vmem>>, vector<1x256xf32>
    %6 = vector.broadcast %5 : vector<1x256xf32> to vector<128x256xf32>
    %7 = arith.addf %4, %6 : vector<128x256xf32>
    %cst_8 = arith.constant dense<0xFF800000> : vector<128xf32>
    %8 = vector.multi_reduction <maximumf>, %7, %cst_8 [1] : vector<128x256xf32> to vector<128xf32>
    %9 = vector.shape_cast %8 : vector<128xf32> to vector<128x1xf32>
    %10 = vector.broadcast %9 : vector<128x1xf32> to vector<128x256xf32>
    %11 = arith.subf %7, %10 : vector<128x256xf32>
    %12 = math.exp %11 : vector<128x256xf32>
    %cst_9 = arith.constant dense<0.000000e+00> : vector<128xf32>
    %13 = vector.multi_reduction <add>, %12, %cst_9 [1] : vector<128x256xf32> to vector<128xf32>
    %14 = vector.shape_cast %13 : vector<128xf32> to vector<128x1xf32>
    %15 = math.log %14 : vector<128x1xf32>
    %c0_10 = arith.constant 0 : index
    %16 = memref.load %arg5[%c0_10] : memref<1xf32, #tpu.memory_space<smem>>
    %17 = vector.broadcast %16 : f32 to vector<128x1xf32>
    %18 = arith.addf %9, %17 : vector<128x1xf32>
    %19 = arith.addf %18, %15 : vector<128x1xf32>
    %20 = vector.broadcast %19 : vector<128x1xf32> to vector<128x256xf32>
    %21 = arith.cmpf oge, %7, %20 : vector<128x256xf32>
    %cst_11 = arith.constant 1.000000e+00 : f32
    %cst_12 = arith.constant 0.000000e+00 : f32
    %22 = vector.broadcast %cst_11 : f32 to vector<128x256xf32>
    %23 = vector.broadcast %cst_12 : f32 to vector<128x256xf32>
    %24 = arith.select %21, %22, %23 : vector<128x256xi1>, vector<128x256xf32>
    %c0_13 = arith.constant 0 : index
    %c0_14 = arith.constant 0 : index
    %25 = vector.load %arg6[%c0_13, %c0_14] : memref<128x256xf32, #tpu.memory_space<vmem>>, vector<128x256xf32>
    tpu.vector_store %arg6[%c0_13, %c0_14], %24 {strides = array<i32>} : memref<128x256xf32, #tpu.memory_space<vmem>>, vector<128x256xf32>,
    return
  }
  func.func @transform_0(%arg0: i32) -> (i32, i32) {
    %c0_i32 = arith.constant 0 : i32
    %c0_i32_0 = arith.constant 0 : i32
    return %arg0, %c0_i32 : i32, i32
  }
  func.func @transform_1(%arg0: i32) -> (i32, i32) {
    %c0_i32 = arith.constant 0 : i32
    %c0_i32_0 = arith.constant 0 : i32
    %c0_i32_1 = arith.constant 0 : i32
    return %c0_i32, %c0_i32_0 : i32, i32
  }
  func.func @transform_2(%arg0: i32) -> (i32, i32) {
    %c0_i32 = arith.constant 0 : i32
    %c0_i32_0 = arith.constant 0 : i32
    %c0_i32_1 = arith.constant 0 : i32
    return %c0_i32, %c0_i32_0 : i32, i32
  }
  func.func @transform_3(%arg0: i32) -> (i32, i32) {
    %c0_i32 = arith.constant 0 : i32
    %c0_i32_0 = arith.constant 0 : i32
    %c0_i32_1 = arith.constant 0 : i32
    return %c0_i32, %c0_i32_0 : i32, i32
  }
  func.func @transform_4(%arg0: i32) -> i32 {
    %c0_i32 = arith.constant 0 : i32
    %c0_i32_0 = arith.constant 0 : i32
    return %c0_i32 : i32
  }
  func.func @transform_5(%arg0: i32) -> (i32, i32) {
    %c0_i32 = arith.constant 0 : i32
    %c0_i32_0 = arith.constant 0 : i32
    return %arg0, %c0_i32 : i32, i32
  }
}

</mosaic_0001>

<bundles_post_ra>
// kernel: tpu_custom_call.1
= control target key start
LH: loop header
LB: loop body
LE: loop exit
PB: predicated region body
PF: predicated region fallthrough
CT: control target
= control target key end

     0   :  { %s2243_s0 = inlined_call_operand.vmem [shape: f32[256,32], index: 0, kind: input, shape index: {}]   ;;  %s2244_s1 = inlined_call_operand.vmem [shape: f32[256,32], index: 1, kind: input, shape index: {}]   ;;  %s2245_s2 = inlined_call_operand.vmem [shape: f32[32,32], index: 2, kind: input, shape index: {}]   ;;  %s2246_s3 = inlined_call_operand.vmem [shape: f32[1,256], index: 3, kind: input, shape index: {}]   ;;  %s2247_s4 = inlined_call_operand.<no memory space> [shape: f32[1], index: 4, kind: input, shape index: {}]   ;;  %s2248_s5 = inlined_call_operand.hbm [shape: f32[256,256], index: 5, kind: output, shape index: {}]  }
   0x1   :  { %10 = sst [smem:[#allocation2]] %s2247_s4 }
   0x2   :  { %11 = vsyncpa [#allocation4], 0 }
   0x3   :  { %13 = vsyncpa [#allocation4 + $0x1], 0  ;;  %s1487_s20 = smov 0   ;;  %s1489_s21 = smov 0  }
   0x4   :  { %s1491_s22 = smov 0   ;;  %s1493_s23 = smov 0  }
   0x5 LB: > { %s1508_s4 = sadd.s32 4294967295, %s1449_s23   ;;  %s1106_s24 = sadd.s32 4294967294, %s1449_s23   ;;  %s1449_s23 = sphi %s1493_s23, %s2254_s23   ;;  %s1445_s22 = sphi %s1491_s22, %s2253_s22   ;;  %s1441_s21 = sphi %s1489_s21, %s2252_s21   ;;  %s1437_s20 = sphi %s1487_s20, %s2251_s20  }
   0x6   : > { %s1512_s25 = sadd.s32 1, %s1449_s23   ;;  %s136_s26 = sadd.s32 1, %s1445_s22 }
   0x7   : > { %s133_s27 = ssub.s32 %s1449_s23, %s1512_s25  ;;  %p146_p0 = scmp.ne.s32.totalorder %s1445_s22, %s1441_s21 }
   0x8   : > { %p134_p1 = scmp.eq.s32.totalorder %s133_s27, 0  ;;  %p147_p2 = scmp.eq.s32.totalorder %s1508_s4, 1 }
   0x9   : > { %p152_p3 = scmp.ne.s32.totalorder %s1441_s21, %s1437_s20  ;;  %p153_p4 = scmp.eq.s32.totalorder %s1106_s24, 1 }
   0xa   : > { %s1523_s28 = scalar_select %p134_p1, %s1445_s22, %s136_s26  }
   0xb   : > { %p1525_p5 = por %p147_p2, %p146_p0  ;;  %p1529_p6 = por %p153_p4, %p152_p3 }
   0xc   : > { %p1109_p7 = scmp.ge.s32.totalorder %s1449_s23, 1  ;;  %p192_p8 = scmp.lt.s32.totalorder %s1449_s23, 3 }
   0xe   : > { %p193_p9 = pnand %p1109_p7, %p192_p8 }
   0xf   : > { %s1111_s10 = sshll.u32 (!%p193_p9), %s1508_s4, 4  ;;  %s897_s24 = sld [smem:[#allocation2]] (!%p193_p9) }
  0x10   : > { %196 = sbr.rel (%p193_p9) target bundleno = 699 (0x2bb), region = 40  ;;  %p221_p10 = scmp.lt.s32.totalorder (!%p193_p9), %s1111_s10, 31 }
  0x11   : > { %s217_s26 = sand.u32 (!%p193_p9), 1, %s1441_s21   ;;  %s1200_s7 = sshll.u32 (!%p193_p9), %s1508_s4, 8 }
  0x12   : > { %s1110_s27 = sshll.u32 (!%p193_p9), %s217_s26, 8  ;;  %s1028_s12 = scalar_lea.sflag (!%p193_p9), [#allocation4], %s217_s26 }
  0x13   : > { %s2085_s6 = scalar_lea.vmem (!%p193_p9), [#allocation3], %s1110_s27  ;;  %s1407_s17 = scalar_lea.hbm (!%p193_p9), %s2248_s5, 512 }
  0x14   : > { %s1041_s4 = sshll.u32 (!%p193_p9), %s2085_s6, 4  ;;  %s1042_s4 = int_to_ptr.vmem [resolvable:$true] %s1041_s4 }
  0x15   : > { %v246_v0 = vld [vmem:[%s2245_s2 + $0x18] sm:$0xff]  ;;  %v245_v1 = vld [vmem:[%s2245_s2 + $0x10] sm:$0xff]  ;;  %v244_v2 = vld [vmem:[%s2245_s2 + $0x8] sm:$0xff]  ;;  %s2256_s10 = smov (!%p221_p10, %s1111_s10), 31  ;;  %vm247_vm0 = vcmask 261120  }
  0x16   : > { %308 = vmatpush.msra.mxu0 %v246_v0  ;;  %v243_v3 = vld [vmem:[%s2245_s2] sm:$0xff]  ;;  %s1112_s15 = sshll.u32 %s2256_s10, 3  ;;  %v376_v8 = vld [vmem:[%s2244_s1 + $0x78] sm:$0xff]  ;;  %v375_v11 = vld [vmem:[%s2244_s1 + $0x70] sm:$0xff]  ;;  %s1040_s10 = scalar_lea.hbm %s2248_s5, %s1200_s7 }
  0x17   : > { %s1551_s18 = scalar_lea.vmem %s2243_s0, %s1112_s15  ;;  %1129 = vmatpush.xpose.msk.msra.mxu1 %vm247_vm0, %v376_v8  ;;  %1201 = vmatpush.xpose.msk.msra.mxu3 %vm247_vm0, %v376_v8  ;;  %v1571_v10 = vld [vmem:[%s2244_s1 + $0xf8] sm:$0xff]  ;;  %v1582_v12 = vld [vmem:[%s2244_s1 + $0xf0] sm:$0xff]  ;;  %v374_v13 = vld [vmem:[%s2244_s1 + $0x68] sm:$0xff]  ;;  %s1043_s11 = sshll.u32 %s1040_s10, 4  ;;  %s1044_s11 = int_to_ptr.hbm [resolvable:$true] %s1043_s11 }
  0x18   : > { %309 = vmatpush.msra.mxu0 %v245_v1  ;;  %v227_v4 = vld [vmem:[%s1551_s18] sm:$0xff]  ;;  %v228_v5 = vld [vmem:[%s1551_s18 + $0x8] sm:$0xff]  ;;  %v229_v6 = vld [vmem:[%s1551_s18 + $0x10] sm:$0xff]  ;;  %1217 = vmatpush.xpose.msk.msra.mxu2 %vm247_vm0, %v1571_v10  ;;  %s1401_s13 = sshra.s32 %s1044_s11, 4  ;;  %s1402_s13 = int_to_ptr.hbm [resolvable:$true] %s1401_s13 }
  0x19   : > { %v230_v7 = vld [vmem:[%s1551_s18 + $0x18] sm:$0xff]  ;;  %v231_v9 = vld [vmem:[%s1551_s18 + $0x20] sm:$0xff]  ;;  %v232_v14 = vld [vmem:[%s1551_s18 + $0x28] sm:$0xff]  ;;  %s1403_s14 = scalar_lea.hbm %s1402_s13, 256  ;;  %p1408_p0 = scmp.lt.s32.totalorder %s1402_s13, %s2248_s5 }
  0x1a   : > { %310 = vmatpush.msra.mxu0 %v244_v2  ;;  %v1601_v15 = vld [vmem:[%s2244_s1 + $0xe8] sm:$0xff]  ;;  %v373_v16 = vld [vmem:[%s2244_s1 + $0x60] sm:$0xff]  ;;  %v372_v18 = vld [vmem:[%s2244_s1 + $0x58] sm:$0xff]  ;;  %p1404_p11 = scmp.ne.s32.totalorder %s1402_s13, %s1403_s14  ;;  %p1409_p1 = scmp.lt.s32.totalorder %s1407_s17, %s1403_s14 }
  0x1b   : > { %1130 = vmatpush.xpose.msk.msra.mxu1 %vm247_vm0, %v375_v11  ;;  %1202 = vmatpush.xpose.msk.msra.mxu3 %vm247_vm0, %v375_v11  ;;  %v1612_v17 = vld [vmem:[%s2244_s1 + $0xe0] sm:$0xff]  ;;  %v233_v19 = vld [vmem:[%s1551_s18 + $0x30] sm:$0xff]  ;;  %v1631_v20 = vld [vmem:[%s2244_s1 + $0xd8] sm:$0xff] }
  0x1c   : > { %311 = vmatpush.msra.mxu0 %v243_v3  ;;  %1219 = vmatpush.xpose.msk.msra.mxu2 %vm247_vm0, %v1582_v12  ;;  %v371_v21 = vld [vmem:[%s2244_s1 + $0x50] sm:$0xff]  ;;  %v370_v23 = vld [vmem:[%s2244_s1 + $0x48] sm:$0xff]  ;;  %v234_v24 = vld [vmem:[%s1551_s18 + $0x38] sm:$0xff]  ;;  %p1405_p12 = pnand %p1404_p11, %p1525_p5  ;;  %p1410_p2 = por %p1409_p1, %p1408_p0 }
  0x1d   : > { %1113 = vmatmul.msk.f32.vlgmr.msra.gmra.mxu0 %vm247_vm0, %v227_v4  ;;  %v1642_v22 = vld [vmem:[%s2244_s1 + $0xd0] sm:$0xff]  ;;  %v1661_v25 = vld [vmem:[%s2244_s1 + $0xc8] sm:$0xff]  ;;  %v369_v26 = vld [vmem:[%s2244_s1 + $0x40] sm:$0xff] }
  0x1e   : > { %1161 = vmatpush.xpose.msk.msrb.mxu0 %vm247_vm0, %v1571_v10  ;;  %v1672_v27 = vld [vmem:[%s2244_s1 + $0xc0] sm:$0xff]  ;;  %v368_v28 = vld [vmem:[%s2244_s1 + $0x38] sm:$0xff]  ;;  %v367_v31 = vld [vmem:[%s2244_s1 + $0x30] sm:$0xff]  ;;  %p1406_p13 = pneg %p1405_p12 }
  0x1f   : > { %1131 = vmatpush.xpose.msk.msra.mxu1 %vm247_vm0, %v374_v13  ;;  %1203 = vmatpush.xpose.msk.msra.mxu3 %vm247_vm0, %v374_v13  ;;  %v235_v29 = vld [vmem:[%s1551_s18 + $0x40] sm:$0xff]  ;;  %v1691_v30 = vld [vmem:[%s2244_s1 + $0xb8] sm:$0xff]  ;;  %v1702_v32 = vld [vmem:[%s2244_s1 + $0xb0] sm:$0xff] }
  0x20   : > { %1221 = vmatpush.xpose.msk.msra.mxu2 %vm247_vm0, %v1601_v15  ;;  %v366_v33 = vld [vmem:[%s2244_s1 + $0x28] sm:$0xff]  ;;  %v365_v36 = vld [vmem:[%s2244_s1 + $0x20] sm:$0xff]  ;;  %v364_v38 = vld [vmem:[%s2244_s1 + $0x18] sm:$0xff]  ;;  %p1411_p3 = pnand %p1410_p2, %p1406_p13 }
  0x21   : > { %v236_v34 = vld [vmem:[%s1551_s18 + $0x48] sm:$0xff]  ;;  %v381_v37 = vld [vmem:[%s2244_s1 + $0xa0] sm:$0xff]  ;;  %v237_v39 = vld [vmem:[%s1551_s18 + $0x50] sm:$0xff] }
  0x22   : > { %1162 = vmatpush.xpose.msk.msrb.mxu0 %vm247_vm0, %v1582_v12  ;;  %v382_v35 = vld [vmem:[%s2244_s1 + $0xa8] sm:$0xff]  ;;  %v380_v40 = vld [vmem:[%s2244_s1 + $0x98] sm:$0xff]  ;;  %v363_v41 = vld [vmem:[%s2244_s1 + $0x10] sm:$0xff] }
  0x23   : > { %1132 = vmatpush.xpose.msk.msra.mxu1 %vm247_vm0, %v373_v16  ;;  %1204 = vmatpush.xpose.msk.msra.mxu3 %vm247_vm0, %v373_v16  ;;  %v379_v42 = vld [vmem:[%s2244_s1 + $0x90] sm:$0xff]  ;;  %v362_v43 = vld [vmem:[%s2244_s1 + $0x8] sm:$0xff]  ;;  %v238_v44 = vld [vmem:[%s1551_s18 + $0x58] sm:$0xff] }
  0x24   : > { %1223 = vmatpush.xpose.msk.msra.mxu2 %vm247_vm0, %v1612_v17  ;;  %v378_v45 = vld [vmem:[%s2244_s1 + $0x88] sm:$0xff]  ;;  %v361_v46 = vld [vmem:[%s2244_s1] sm:$0xff]  ;;  %v241_v50 = vld [vmem:[%s1551_s18 + $0x70] sm:$0xff] }
  0x25   : > { %1114 = vmatmul.msk.f32.gmra.mxu0 %vm247_vm0, %v228_v5  ;;  %v377_v47 = vld [vmem:[%s2244_s1 + $0x80] sm:$0xff]  ;;  %v240_v49 = vld [vmem:[%s1551_s18 + $0x68] sm:$0xff]  ;;  %v242_v51 = vld [vmem:[%s1551_s18 + $0x78] sm:$0xff] }
  0x26   : > { %1163 = vmatpush.xpose.msk.msrb.mxu0 %vm247_vm0, %v1601_v15  ;;  %v239_v48 = vld [vmem:[%s1551_s18 + $0x60] sm:$0xff] }
  0x27   : > { %1133 = vmatpush.xpose.msk.msra.mxu1 %vm247_vm0, %v372_v18  ;;  %1205 = vmatpush.xpose.msk.msra.mxu3 %vm247_vm0, %v372_v18  ;;  %v393_v4 = vld [vmem:[%s2246_s3] sm:$0x3] }
  0x28   : > { %1225 = vmatpush.xpose.msk.msra.mxu2 %vm247_vm0, %v1631_v20  ;;  %v1843_v5 = vperm.slane %v393_v4, 0 }
  0x2a   : > { %1164 = vmatpush.xpose.msk.msrb.mxu0 %vm247_vm0, %v1612_v17 }
  0x2b   : > { %1134 = vmatpush.xpose.msk.msra.mxu1 %vm247_vm0, %v371_v21  ;;  %1206 = vmatpush.xpose.msk.msra.mxu3 %vm247_vm0, %v371_v21 }
  0x2c   : > { %1227 = vmatpush.xpose.msk.msra.mxu2 %vm247_vm0, %v1642_v22 }
  0x2d   : > { %1115 = vmatmul.msk.f32.gmra.mxu0 %vm247_vm0, %v229_v6  ;;  %v1845_v6 = vperm.slane %v393_v4, 1 }
  0x2e   : > { %1165 = vmatpush.xpose.msk.msrb.mxu0 %vm247_vm0, %v1631_v20 }
  0x2f   : > { %1135 = vmatpush.xpose.msk.msra.mxu1 %vm247_vm0, %v370_v23  ;;  %1207 = vmatpush.xpose.msk.msra.mxu3 %vm247_vm0, %v370_v23 }
  0x30   : > { %1229 = vmatpush.xpose.msk.msra.mxu2 %vm247_vm0, %v1661_v25 }
  0x32   : > { %1166 = vmatpush.xpose.msk.msrb.mxu0 %vm247_vm0, %v1642_v22 }
  0x33   : > { %1136 = vmatpush.xpose.msk.msra.mxu1 %vm247_vm0, %v369_v26  ;;  %1208 = vmatpush.xpose.msk.msra.mxu3 %vm247_vm0, %v369_v26 }
  0x34   : > { %1231 = vmatpush.xpose.msk.msra.mxu2 %vm247_vm0, %v1672_v27 }
  0x35   : > { %1116 = vmatmul.msk.f32.gmra.mxu0 %vm247_vm0, %v230_v7 }
  0x36   : > { %1167 = vmatpush.xpose.msk.msrb.mxu0 %vm247_vm0, %v1661_v25 }
  0x37   : > { %1137 = vmatpush.xpose.msk.msra.mxu1 %vm247_vm0, %v368_v28  ;;  %1209 = vmatpush.xpose.msk.msra.mxu3 %vm247_vm0, %v368_v28 }
  0x38   : > { %1233 = vmatpush.xpose.msk.msra.mxu2 %vm247_vm0, %v1691_v30 }
  0x3a   : > { %1168 = vmatpush.xpose.msk.msrb.mxu0 %vm247_vm0, %v1672_v27 }
  0x3b   : > { %1138 = vmatpush.xpose.msk.msra.mxu1 %vm247_vm0, %v367_v31  ;;  %1210 = vmatpush.xpose.msk.msra.mxu3 %vm247_vm0, %v367_v31 }
  0x3c   : > { %1235 = vmatpush.xpose.msk.msra.mxu2 %vm247_vm0, %v1702_v32 }
  0x3d   : > { %1117 = vmatmul.msk.f32.gmra.mxu0 %vm247_vm0, %v231_v9 }
  0x3e   : > { %1169 = vmatpush.xpose.msk.msrb.mxu0 %vm247_vm0, %v1691_v30 }
  0x3f   : > { %1139 = vmatpush.xpose.msk.msra.mxu1 %vm247_vm0, %v366_v33  ;;  %1211 = vmatpush.xpose.msk.msra.mxu3 %vm247_vm0, %v366_v33 }
  0x40   : > { %1237 = vmatpush.xpose.msk.msra.mxu2 %vm247_vm0, %v382_v35 }
  0x42   : > { %1170 = vmatpush.xpose.msk.msrb.mxu0 %vm247_vm0, %v1702_v32 }
  0x43   : > { %1140 = vmatpush.xpose.msk.msra.mxu1 %vm247_vm0, %v365_v36  ;;  %1212 = vmatpush.xpose.msk.msra.mxu3 %vm247_vm0, %v365_v36 }
  0x44   : > { %1239 = vmatpush.xpose.msk.msra.mxu2 %vm247_vm0, %v381_v37 }
  0x45   : > { %1118 = vmatmul.msk.f32.gmra.mxu0 %vm247_vm0, %v232_v14 }
  0x46   : > { %1171 = vmatpush.xpose.msk.msrb.mxu0 %vm247_vm0, %v382_v35 }
  0x47   : > { %1141 = vmatpush.xpose.msk.msra.mxu1 %vm247_vm0, %v364_v38  ;;  %1213 = vmatpush.xpose.msk.msra.mxu3 %vm247_vm0, %v364_v38 }
  0x48   : > { %1241 = vmatpush.xpose.msk.msra.mxu2 %vm247_vm0, %v380_v40 }
  0x4a   : > { %1172 = vmatpush.xpose.msk.msrb.mxu0 %vm247_vm0, %v381_v37 }
  0x4b   : > { %1142 = vmatpush.xpose.msk.msra.mxu1 %vm247_vm0, %v363_v41  ;;  %1214 = vmatpush.xpose.msk.msra.mxu3 %vm247_vm0, %v363_v41 }
  0x4c   : > { %1243 = vmatpush.xpose.msk.msra.mxu2 %vm247_vm0, %v379_v42 }
  0x4d   : > { %1119 = vmatmul.msk.f32.gmra.mxu0 %vm247_vm0, %v233_v19 }
  0x4e   : > { %1173 = vmatpush.xpose.msk.msrb.mxu0 %vm247_vm0, %v380_v40 }
  0x4f   : > { %1143 = vmatpush.xpose.msk.msra.mxu1 %vm247_vm0, %v362_v43  ;;  %1215 = vmatpush.xpose.msk.msra.mxu3 %vm247_vm0, %v362_v43 }
  0x50   : > { %1245 = vmatpush.xpose.msk.msra.mxu2 %vm247_vm0, %v378_v45 }
  0x52   : > { %1174 = vmatpush.xpose.msk.msrb.mxu0 %vm247_vm0, %v379_v42 }
  0x53   : > { %1144 = vmatpush.xpose.msk.msra.mxu1 %vm247_vm0, %v361_v46  ;;  %1216 = vmatpush.xpose.msk.msra.mxu3 %vm247_vm0, %v361_v46 }
  0x54   : > { %1247 = vmatpush.xpose.msk.msra.mxu2 %vm247_vm0, %v377_v47 }
  0x55   : > { %1120 = vmatmul.msk.f32.gmra.mxu0 %vm247_vm0, %v234_v24 }
  0x56   : > { %1175 = vmatpush.xpose.msk.msrb.mxu0 %vm247_vm0, %v378_v45 }
  0x57   : > { %1218 = vmatpush.xpose.msk.msrb.mxu3 %vm247_vm0, %v1571_v10 }
  0x5a   : > { %1176 = vmatpush.xpose.msk.msrb.mxu0 %vm247_vm0, %v377_v47 }
  0x5b   : > { %1220 = vmatpush.xpose.msk.msrb.mxu3 %vm247_vm0, %v1582_v12 }
  0x5d   : > { %1121 = vmatmul.msk.f32.gmra.mxu0 %vm247_vm0, %v235_v29 }
  0x5f   : > { %1222 = vmatpush.xpose.msk.msrb.mxu3 %vm247_vm0, %v1601_v15 }
  0x63   : > { %1224 = vmatpush.xpose.msk.msrb.mxu3 %vm247_vm0, %v1612_v17 }
  0x65   : > { %1122 = vmatmul.msk.f32.gmra.mxu0 %vm247_vm0, %v236_v34 }
  0x67   : > { %1226 = vmatpush.xpose.msk.msrb.mxu3 %vm247_vm0, %v1631_v20 }
  0x6b   : > { %1228 = vmatpush.xpose.msk.msrb.mxu3 %vm247_vm0, %v1642_v22 }
  0x6d   : > { %1123 = vmatmul.msk.f32.gmra.mxu0 %vm247_vm0, %v237_v39 }
  0x6f   : > { %1230 = vmatpush.xpose.msk.msrb.mxu3 %vm247_vm0, %v1661_v25 }
  0x73   : > { %1232 = vmatpush.xpose.msk.msrb.mxu3 %vm247_vm0, %v1672_v27 }
  0x75   : > { %1124 = vmatmul.msk.f32.gmra.mxu0 %vm247_vm0, %v238_v44 }
  0x77   : > { %1234 = vmatpush.xpose.msk.msrb.mxu3 %vm247_vm0, %v1691_v30 }
  0x7b   : > { %1236 = vmatpush.xpose.msk.msrb.mxu3 %vm247_vm0, %v1702_v32 }
  0x7d   : > { %1125 = vmatmul.msk.f32.gmra.mxu0 %vm247_vm0, %v239_v48 }
  0x7f   : > { %1238 = vmatpush.xpose.msk.msrb.mxu3 %vm247_vm0, %v382_v35 }
  0x83   : > { %1240 = vmatpush.xpose.msk.msrb.mxu3 %vm247_vm0, %v381_v37 }
  0x85   : > { %1126 = vmatmul.msk.f32.gmra.mxu0 %vm247_vm0, %v240_v49 }
  0x87   : > { %1242 = vmatpush.xpose.msk.msrb.mxu3 %vm247_vm0, %v380_v40 }
  0x8b   : > { %1244 = vmatpush.xpose.msk.msrb.mxu3 %vm247_vm0, %v379_v42 }
  0x8d   : > { %1127 = vmatmul.msk.f32.gmra.mxu0 %vm247_vm0, %v241_v50 }
  0x8f   : > { %1246 = vmatpush.xpose.msk.msrb.mxu3 %vm247_vm0, %v378_v45 }
  0x93   : > { %1248 = vmatpush.xpose.msk.msrb.mxu3 %vm247_vm0, %v377_v47 }
  0x95   : > { %1128 = vmatmul.msk.f32.gmra.mxu0 %vm247_vm0, %v242_v51 }
  0x9a   : > { %v313_v52 = vpop.f32.mrf.mxu0 }
  0x9b   : > { %1145 = vmatmul.msk.f32.vlgmr.msra.gmra.mxu1 %vm247_vm0, %v313_v52 }
  0x9d   : > { %1177 = vmatmul.msk.f32.vlgmr.msrb.gmra.mxu0 %vm247_vm0, %v313_v52 }
  0xa2   : > { %v316_v53 = vpop.f32.mrf.mxu0 }
  0xa3   : > { %1146 = vmatmul.msk.f32.gmra.mxu1 %vm247_vm0, %v316_v53 }
  0xa5   : > { %1178 = vmatmul.msk.f32.gmra.mxu0 %vm247_vm0, %v316_v53 }
  0xaa   : > { %v319_v54 = vpop.f32.mrf.mxu0 }
  0xab   : > { %1147 = vmatmul.msk.f32.gmra.mxu1 %vm247_vm0, %v319_v54  ;;  %1179 = vmatmul.msk.f32.vlgmr.msra.gmra.mxu2 %vm247_vm0, %v319_v54 }
  0xb2   : > { %v322_v55 = vpop.f32.mrf.mxu0 }
  0xb3   : > { %1148 = vmatmul.msk.f32.gmra.mxu1 %vm247_vm0, %v322_v55  ;;  %1180 = vmatmul.msk.f32.gmra.mxu2 %vm247_vm0, %v322_v55 }
  0xba   : > { %v325_v56 = vpop.f32.mrf.mxu0 }
  0xbb   : > { %1149 = vmatmul.msk.f32.gmra.mxu1 %vm247_vm0, %v325_v56  ;;  %1181 = vmatmul.msk.f32.gmra.mxu2 %vm247_vm0, %v325_v56 }
  0xc2   : > { %v328_v57 = vpop.f32.mrf.mxu0 }
  0xc3   : > { %1150 = vmatmul.msk.f32.gmra.mxu1 %vm247_vm0, %v328_v57  ;;  %1182 = vmatmul.msk.f32.gmra.mxu2 %vm247_vm0, %v328_v57 }
  0xca   : > { %v331_v58 = vpop.f32.mrf.mxu0 }
  0xcb   : > { %1151 = vmatmul.msk.f32.gmra.mxu1 %vm247_vm0, %v331_v58  ;;  %1183 = vmatmul.msk.f32.gmra.mxu2 %vm247_vm0, %v331_v58 }
  0xd2   : > { %v334_v59 = vpop.f32.mrf.mxu0 }
  0xd3   : > { %1152 = vmatmul.msk.f32.gmra.mxu1 %vm247_vm0, %v334_v59  ;;  %1184 = vmatmul.msk.f32.gmra.mxu2 %vm247_vm0, %v334_v59 }
  0xda   : > { %v337_v60 = vpop.f32.mrf.mxu0 }
  0xdb   : > { %1153 = vmatmul.msk.f32.gmra.mxu1 %vm247_vm0, %v337_v60  ;;  %1185 = vmatmul.msk.f32.gmra.mxu2 %vm247_vm0, %v337_v60 }
  0xe2   : > { %v340_v61 = vpop.f32.mrf.mxu0 }
  0xe3   : > { %1154 = vmatmul.msk.f32.gmra.mxu1 %vm247_vm0, %v340_v61  ;;  %1186 = vmatmul.msk.f32.gmra.mxu2 %vm247_vm0, %v340_v61 }
  0xea   : > { %v343_v62 = vpop.f32.mrf.mxu0 }
  0xeb   : > { %1155 = vmatmul.msk.f32.gmra.mxu1 %vm247_vm0, %v343_v62  ;;  %1187 = vmatmul.msk.f32.gmra.mxu2 %vm247_vm0, %v343_v62 }
  0xf2   : > { %v346_v63 = vpop.f32.mrf.mxu0 }
  0xf3   : > { %1156 = vmatmul.msk.f32.vlgmr.msra.gmra.mxu3 %vm247_vm0, %v346_v63  ;;  %1188 = vmatmul.msk.f32.gmra.mxu2 %vm247_vm0, %v346_v63 }
  0xfa   : > { %v349_v0 = vpop.f32.mrf.mxu0 }
  0xfb   : > { %1157 = vmatmul.msk.f32.gmra.mxu3 %vm247_vm0, %v349_v0  ;;  %1189 = vmatmul.msk.f32.gmra.mxu2 %vm247_vm0, %v349_v0 }
 0x102   : > { %v352_v1 = vpop.f32.mrf.mxu0 }
 0x103   : > { %1158 = vmatmul.msk.f32.gmra.mxu3 %vm247_vm0, %v352_v1 }
 0x10a   : > { %v355_v2 = vpop.f32.mrf.mxu0 }
 0x10b   : > { %1159 = vmatmul.msk.f32.gmra.mxu3 %vm247_vm0, %v355_v2 }
 0x112   : > { %v358_v3 = vpop.f32.mrf.mxu0 }
 0x113   : > { %1160 = vmatmul.msk.f32.gmra.mxu3 %vm247_vm0, %v358_v3 }
 0x118   : > { %v560_v7 = vpop.f32.mrf.mxu1 }
 0x119   : > { %v1848_v9 = vadd.f32 %v560_v7, %v1843_v5 }
 0x11a   : > { %v625_v8 = vpop.f32.mrf.mxu0 }
 0x11b   : > { %v1851_v10 = vadd.f32 %v625_v8, %v1845_v6  ;;  %1190 = vmatmul.msk.f32.vlgmr.msrb.gmra.mxu3 %vm247_vm0, %v352_v1 }
 0x11d   : > { %v673_v11 = vmax.f32 %v1848_v9, %v1851_v10 }
 0x11f   : > { %674 = vmax.xlane.f32.xlu0 %v673_v11 }
 0x120   : > { %v563_v12 = vpop.f32.mrf.mxu1 }
 0x121   : > { %v1857_v14 = vadd.f32 %v563_v12, %v1843_v5 }
 0x122   : > { %v628_v13 = vpop.f32.mrf.mxu0 }
 0x123   : > { %v1860_v15 = vadd.f32 %v628_v13, %v1845_v6  ;;  %1191 = vmatmul.msk.f32.gmra.mxu3 %vm247_vm0, %v355_v2 }
 0x125   : > { %v676_v16 = vmax.f32 %v1857_v14, %v1860_v15 }
 0x127   : > { %677 = vmax.xlane.f32.xlu0 %v676_v16 }
 0x128   : > { %v566_v17 = vpop.f32.mrf.mxu1 }
 0x129   : > { %v1867_v19 = vadd.f32 %v566_v17, %v1843_v5 }
 0x12b   : > { %1192 = vmatmul.msk.f32.gmra.mxu3 %vm247_vm0, %v358_v3 }
 0x12e   : > { %v631_v18 = vpop.f32.mrf.mxu2 }
 0x12f   : > { %v1870_v20 = vadd.f32 %v631_v18, %v1845_v6 }
 0x130   : > { %v569_v21 = vpop.f32.mrf.mxu1 }
 0x131   : > { %v679_v22 = vmax.f32 %v1867_v19, %v1870_v20  ;;  %v1875_v24 = vadd.f32 %v569_v21, %v1843_v5 }
 0x133   : > { %680 = vmax.xlane.f32.xlu1 %v679_v22 }
 0x136   : > { %v634_v23 = vpop.f32.mrf.mxu2 }
 0x137   : > { %v1878_v25 = vadd.f32 %v634_v23, %v1845_v6 }
 0x138   : > { %v572_v26 = vpop.f32.mrf.mxu1 }
 0x139   : > { %v682_v27 = vmax.f32 %v1875_v24, %v1878_v25  ;;  %v1883_v29 = vadd.f32 %v572_v26, %v1843_v5 }
 0x13b   : > { %683 = vmax.xlane.f32.xlu1 %v682_v27 }
 0x13e   : > { %v637_v28 = vpop.f32.mrf.mxu2 }
 0x13f   : > { %v1886_v30 = vadd.f32 %v637_v28, %v1845_v6 }
 0x140   : > { %v575_v31 = vpop.f32.mrf.mxu1 }
 0x141   : > { %v685_v32 = vmax.f32 %v1883_v29, %v1886_v30  ;;  %v1891_v34 = vadd.f32 %v575_v31, %v1843_v5 }
 0x143   : > { %686 = vmax.xlane.f32.xlu2 %v685_v32 }
 0x146   : > { %v640_v33 = vpop.f32.mrf.mxu2 }
 0x147   : > { %v1894_v35 = vadd.f32 %v640_v33, %v1845_v6 }
 0x148   : > { %v578_v36 = vpop.f32.mrf.mxu1 }
 0x149   : > { %v688_v37 = vmax.f32 %v1891_v34, %v1894_v35  ;;  %v1899_v39 = vadd.f32 %v578_v36, %v1843_v5 }
 0x14b   : > { %689 = vmax.xlane.f32.xlu2 %v688_v37 }
 0x14e   : > { %v643_v38 = vpop.f32.mrf.mxu2 }
 0x14f   : > { %v1902_v40 = vadd.f32 %v643_v38, %v1845_v6 }
 0x150   : > { %v581_v41 = vpop.f32.mrf.mxu1 }
 0x151   : > { %v691_v42 = vmax.f32 %v1899_v39, %v1902_v40  ;;  %v1907_v44 = vadd.f32 %v581_v41, %v1843_v5 }
 0x153   : > { %692 = vmax.xlane.f32.xlu0 %v691_v42 }
 0x156   : > { %v646_v43 = vpop.f32.mrf.mxu2 }
 0x157   : > { %v1910_v45 = vadd.f32 %v646_v43, %v1845_v6 }
 0x158   : > { %v584_v46 = vpop.f32.mrf.mxu1 }
 0x159   : > { %v694_v47 = vmax.f32 %v1907_v44, %v1910_v45  ;;  %v1915_v49 = vadd.f32 %v584_v46, %v1843_v5 }
 0x15b   : > { %695 = vmax.xlane.f32.xlu1 %v694_v47 }
 0x15e   : > { %v649_v48 = vpop.f32.mrf.mxu2 }
 0x15f   : > { %v1918_v50 = vadd.f32 %v649_v48, %v1845_v6 }
 0x160   : > { %v587_v52 = vpop.f32.mrf.mxu1 }
 0x161   : > { %v697_v51 = vmax.f32 %v1915_v49, %v1918_v50  ;;  %v1923_v54 = vadd.f32 %v587_v52, %v1843_v5 }
 0x163   : > { %698 = vmax.xlane.f32.xlu2 %v697_v51 }
 0x166   : > { %v652_v53 = vpop.f32.mrf.mxu2 }
 0x167   : > { %v1926_v55 = vadd.f32 %v652_v53, %v1845_v6 }
 0x168   : > { %v590_v57 = vpop.f32.mrf.mxu1 }
 0x169   : > { %v700_v56 = vmax.f32 %v1923_v54, %v1926_v55  ;;  %v1931_v59 = vadd.f32 %v590_v57, %v1843_v5 }
 0x16b   : > { %701 = vmax.xlane.f32.xlu0 %v700_v56 }
 0x16e   : > { %v655_v58 = vpop.f32.mrf.mxu2 }
 0x16f   : > { %v1934_v60 = vadd.f32 %v655_v58, %v1845_v6 }
 0x171   : > { %v703_v61 = vmax.f32 %v1931_v59, %v1934_v60 }
 0x173   : > { %704 = vmax.xlane.f32.xlu1 %v703_v61 }
 0x176   : > { %v593_v62 = vpop.f32.mrf.mxu3  ;;  %v658_v63 = vpop.f32.mrf.mxu2 }
 0x177   : > { %v1939_v0 = vadd.f32 %v593_v62, %v1843_v5  ;;  %v1942_v1 = vadd.f32 %v658_v63, %v1845_v6 }
 0x179   : > { %v706_v2 = vmax.f32 %v1939_v0, %v1942_v1 }
 0x17b   : > { %707 = vmax.xlane.f32.xlu2 %v706_v2 }
 0x17e   : > { %v596_v3 = vpop.f32.mrf.mxu3  ;;  %v661_v4 = vpop.f32.mrf.mxu2 }
 0x17f   : > { %v1947_v7 = vadd.f32 %v596_v3, %v1843_v5  ;;  %v1950_v8 = vadd.f32 %v661_v4, %v1845_v6 }
 0x181   : > { %v709_v11 = vmax.f32 %v1947_v7, %v1950_v8 }
 0x183   : > { %710 = vmax.xlane.f32.xlu0 %v709_v11 }
 0x186   : > { %v599_v12 = vpop.f32.mrf.mxu3 }
 0x187   : > { %v1963_v28 = vadd.f32 %v599_v12, %v1843_v5 }
 0x18e   : > { %v602_v13 = vpop.f32.mrf.mxu3 }
 0x18f   : > { %v1977_v47 = vadd.f32 %v602_v13, %v1843_v5 }
 0x192   : > { %v1954_v16 = vpop.xlane.xlu0 %674 }
 0x193   : > { %v721_v18 = vsub.f32 %v1848_v9, %v1954_v16  ;;  %v722_v21 = vsub.f32 %v1851_v10, %v1954_v16 }
 0x195   : > { %v753_v22 = vmul.f32 1.442695, %v721_v18  ;;  %v755_v23 = vmul.f32 1.442695, %v722_v21 }
 0x196   : > { %v605_v17 = vpop.f32.mrf.mxu3 }
 0x197   : > { %1291 = vpow2.f32 %v753_v22  ;;  %v1989_v63 = vadd.f32 %v605_v17, %v1843_v5 }
 0x198   : > { %1293 = vpow2.f32 %v755_v23 }
 0x19a   : > { %v1960_v26 = vpop.xlane.xlu0 %677 }
 0x19b   : > { %v723_v31 = vsub.f32 %v1857_v14, %v1960_v26  ;;  %v724_v33 = vsub.f32 %v1860_v15, %v1960_v26 }
 0x19d   : > { %v757_v37 = vmul.f32 1.442695, %v723_v31  ;;  %v759_v38 = vmul.f32 1.442695, %v724_v33  ;;  %v1292_v41 = vpop.eup %1291 }
 0x19e   : > { %v664_v27 = vpop.f32.mrf.mxu3  ;;  %v1294_v42 = vpop.eup %1293 }
 0x19f   : > { %v1968_v32 = vadd.f32 %v664_v27, %v1845_v6  ;;  %1295 = vpow2.f32 %v757_v37  ;;  %v817_v56 = vadd.f32 %v1294_v42, %v1292_v41 }
 0x1a0   : > { %1297 = vpow2.f32 %v759_v38 }
 0x1a1   : > { %v712_v36 = vmax.f32 %v1963_v28, %v1968_v32 }
 0x1a3   : > { %713 = vmax.xlane.f32.xlu1 %v712_v36 }
 0x1a5   : > { %v1296_v61 = vpop.eup %1295 }
 0x1a6   : > { %v1974_v43 = vpop.xlane.xlu1 %680  ;;  %v667_v46 = vpop.f32.mrf.mxu3 }
 0x1a7   : > { %v725_v48 = vsub.f32 %v1867_v19, %v1974_v43  ;;  %v1982_v51 = vadd.f32 %v667_v46, %v1845_v6  ;;  %v726_v52 = vsub.f32 %v1870_v20, %v1974_v43  ;;  %v1298_v62 = vpop.eup %1297 }
 0x1a8   : > { %v820_v21 = vadd.f32 %v1298_v62, %v1296_v61 }
 0x1a9   : > { %v715_v53 = vmax.f32 %v1977_v47, %v1982_v51  ;;  %v761_v57 = vmul.f32 1.442695, %v725_v48  ;;  %v763_v58 = vmul.f32 1.442695, %v726_v52 }
 0x1ab   : > { %716 = vmax.xlane.f32.xlu2 %v715_v53  ;;  %818 = vadd.xlane.f32.xlu1 %v817_v56  ;;  %1299 = vpow2.f32 %v761_v57 }
 0x1ac   : > { %1301 = vpow2.f32 %v763_v58 }
 0x1ae   : > { %v1991_v2 = vpop.xlane.xlu1 %683  ;;  %v670_v3 = vpop.f32.mrf.mxu3 }
 0x1af   : > { %v727_v4 = vsub.f32 %v1875_v24, %v1991_v2  ;;  %v728_v11 = vsub.f32 %v1878_v25, %v1991_v2  ;;  %v1998_v12 = vadd.f32 %v670_v3, %v1845_v6 }
 0x1b1   : > { %v765_v13 = vmul.f32 1.442695, %v727_v4  ;;  %v767_v18 = vmul.f32 1.442695, %v728_v11  ;;  %v718_v5 = vmax.f32 %v1989_v63, %v1998_v12  ;;  %v1300_v17 = vpop.eup %1299 }
 0x1b2   : > { %v1302_v22 = vpop.eup %1301 }
 0x1b3   : > { %1303 = vpow2.f32 %v765_v13  ;;  %821 = vadd.xlane.f32.xlu2 %v820_v21  ;;  %719 = vmax.xlane.f32.xlu0 %v718_v5  ;;  %v823_v37 = vadd.f32 %v1302_v22, %v1300_v17 }
 0x1b4   : > { %1305 = vpow2.f32 %v767_v18 }
 0x1b6   : > { %v2002_v23 = vpop.xlane.xlu2 %686 }
 0x1b7   : > { %v729_v27 = vsub.f32 %v1883_v29, %v2002_v23  ;;  %v730_v6 = vsub.f32 %v1886_v30, %v2002_v23 }
 0x1b9   : > { %v1304_v31 = vpop.eup %1303  ;;  %v769_v33 = vmul.f32 1.442695, %v729_v27  ;;  %v771_v36 = vmul.f32 1.442695, %v730_v6 }
 0x1ba   : > { %v1306_v38 = vpop.eup %1305 }
 0x1bb   : > { %1307 = vpow2.f32 %v769_v33  ;;  %824 = vadd.xlane.f32.xlu0 %v823_v37  ;;  %v826_v41 = vadd.f32 %v1306_v38, %v1304_v31 }
 0x1bc   : > { %1309 = vpow2.f32 %v771_v36 }
 0x1bd   : > { %827 = vadd.xlane.f32.xlu1 %v826_v41 }
 0x1be   : > { %v2008_v42 = vpop.xlane.xlu2 %689 }
 0x1bf   : > { %v731_v46 = vsub.f32 %v1891_v34, %v2008_v42  ;;  %v732_v48 = vsub.f32 %v1894_v35, %v2008_v42 }
 0x1c1   : > { %v1308_v52 = vpop.eup %1307  ;;  %v773_v53 = vmul.f32 1.442695, %v731_v46  ;;  %v775_v56 = vmul.f32 1.442695, %v732_v48 }
 0x1c2   : > { %v1310_v57 = vpop.eup %1309 }
 0x1c3   : > { %1311 = vpow2.f32 %v773_v53  ;;  %v829_v58 = vadd.f32 %v1310_v57, %v1308_v52 }
 0x1c4   : > { %1313 = vpow2.f32 %v775_v56 }
 0x1c5   : > { %830 = vadd.xlane.f32.xlu2 %v829_v58 }
 0x1c6   : > { %v2014_v61 = vpop.xlane.xlu0 %692 }
 0x1c7   : > { %v733_v62 = vsub.f32 %v1899_v39, %v2014_v61  ;;  %v734_v3 = vsub.f32 %v1902_v40, %v2014_v61 }
 0x1c9   : > { %v1312_v4 = vpop.eup %1311  ;;  %v777_v11 = vmul.f32 1.442695, %v733_v62  ;;  %v779_v13 = vmul.f32 1.442695, %v734_v3 }
 0x1ca   : > { %v1314_v18 = vpop.eup %1313 }
 0x1cb   : > { %1315 = vpow2.f32 %v777_v11  ;;  %v832_v21 = vadd.f32 %v1314_v18, %v1312_v4 }
 0x1cc   : > { %1317 = vpow2.f32 %v779_v13 }
 0x1cd   : > { %833 = vadd.xlane.f32.xlu0 %v832_v21 }
 0x1ce   : > { %v2020_v5 = vpop.xlane.xlu1 %695 }
 0x1cf   : > { %v735_v17 = vsub.f32 %v1907_v44, %v2020_v5  ;;  %v736_v22 = vsub.f32 %v1910_v45, %v2020_v5 }
 0x1d1   : > { %v1316_v27 = vpop.eup %1315  ;;  %v781_v6 = vmul.f32 1.442695, %v735_v17  ;;  %v783_v31 = vmul.f32 1.442695, %v736_v22 }
 0x1d2   : > { %v1318_v33 = vpop.eup %1317 }
 0x1d3   : > { %1319 = vpow2.f32 %v781_v6  ;;  %v835_v36 = vadd.f32 %v1318_v33, %v1316_v27 }
 0x1d4   : > { %1321 = vpow2.f32 %v783_v31 }
 0x1d5   : > { %836 = vadd.xlane.f32.xlu1 %v835_v36 }
 0x1d6   : > { %v2026_v37 = vpop.xlane.xlu2 %698 }
 0x1d7   : > { %v737_v38 = vsub.f32 %v1915_v49, %v2026_v37  ;;  %v738_v41 = vsub.f32 %v1918_v50, %v2026_v37 }
 0x1d9   : > { %v1320_v46 = vpop.eup %1319  ;;  %v785_v48 = vmul.f32 1.442695, %v737_v38  ;;  %v787_v52 = vmul.f32 1.442695, %v738_v41 }
 0x1da   : > { %v1322_v53 = vpop.eup %1321 }
 0x1db   : > { %1323 = vpow2.f32 %v785_v48  ;;  %v838_v56 = vadd.f32 %v1322_v53, %v1320_v46 }
 0x1dc   : > { %1325 = vpow2.f32 %v787_v52 }
 0x1dd   : > { %839 = vadd.xlane.f32.xlu2 %v838_v56 }
 0x1de   : > { %v2032_v57 = vpop.xlane.xlu0 %701 }
 0x1df   : > { %v739_v58 = vsub.f32 %v1923_v54, %v2032_v57  ;;  %v740_v62 = vsub.f32 %v1926_v55, %v2032_v57 }
 0x1e1   : > { %v1324_v3 = vpop.eup %1323  ;;  %v789_v4 = vmul.f32 1.442695, %v739_v58  ;;  %v791_v11 = vmul.f32 1.442695, %v740_v62 }
 0x1e2   : > { %v1326_v13 = vpop.eup %1325 }
 0x1e3   : > { %1327 = vpow2.f32 %v789_v4  ;;  %v841_v18 = vadd.f32 %v1326_v13, %v1324_v3 }
 0x1e4   : > { %1329 = vpow2.f32 %v791_v11 }
 0x1e5   : > { %842 = vadd.xlane.f32.xlu0 %v841_v18 }
 0x1e6   : > { %v2038_v21 = vpop.xlane.xlu1 %704 }
 0x1e7   : > { %v741_v17 = vsub.f32 %v1931_v59, %v2038_v21  ;;  %v742_v22 = vsub.f32 %v1934_v60, %v2038_v21 }
 0x1e9   : > { %v1328_v27 = vpop.eup %1327  ;;  %v793_v6 = vmul.f32 1.442695, %v741_v17  ;;  %v795_v31 = vmul.f32 1.442695, %v742_v22 }
 0x1ea   : > { %v1330_v33 = vpop.eup %1329 }
 0x1eb   : > { %1331 = vpow2.f32 %v793_v6  ;;  %v844_v36 = vadd.f32 %v1330_v33, %v1328_v27 }
 0x1ec   : > { %1333 = vpow2.f32 %v795_v31 }
 0x1ed   : > { %845 = vadd.xlane.f32.xlu1 %v844_v36 }
 0x1ee   : > { %v2044_v38 = vpop.xlane.xlu2 %707 }
 0x1ef   : > { %v743_v41 = vsub.f32 %v1939_v0, %v2044_v38  ;;  %v744_v46 = vsub.f32 %v1942_v1, %v2044_v38 }
 0x1f1   : > { %v1332_v48 = vpop.eup %1331  ;;  %v797_v52 = vmul.f32 1.442695, %v743_v41  ;;  %v799_v53 = vmul.f32 1.442695, %v744_v46 }
 0x1f2   : > { %v1334_v56 = vpop.eup %1333 }
 0x1f3   : > { %1335 = vpow2.f32 %v797_v52  ;;  %v847_v58 = vadd.f32 %v1334_v56, %v1332_v48 }
 0x1f4   : > { %1337 = vpow2.f32 %v799_v53 }
 0x1f5   : > { %848 = vadd.xlane.f32.xlu2 %v847_v58 }
 0x1f6   : > { %v2050_v62 = vpop.xlane.xlu0 %710 }
 0x1f7   : > { %v745_v3 = vsub.f32 %v1947_v7, %v2050_v62  ;;  %v746_v4 = vsub.f32 %v1950_v8, %v2050_v62 }
 0x1f9   : > { %v1336_v11 = vpop.eup %1335  ;;  %v801_v13 = vmul.f32 1.442695, %v745_v3  ;;  %v803_v18 = vmul.f32 1.442695, %v746_v4 }
 0x1fa   : > { %v1338_v17 = vpop.eup %1337 }
 0x1fb   : > { %1339 = vpow2.f32 %v801_v13  ;;  %v850_v22 = vadd.f32 %v1338_v17, %v1336_v11 }
 0x1fc   : > { %1341 = vpow2.f32 %v803_v18  ;;  %v2068_v18 = vstv %s897_s24 }
 0x1fd   : > { %851 = vadd.xlane.f32.xlu0 %v850_v22 }
 0x201   : > { %v1340_v27 = vpop.eup %1339 }
 0x202   : > { %v1342_v6 = vpop.eup %1341 }
 0x203   : > { %v853_v31 = vadd.f32 %v1342_v6, %v1340_v27  ;;  %v899_v27 = vadd.f32 %v2068_v18, %v1954_v16  ;;  %v1451_v16 = vmov 0.0  }
 0x205   : > { %854 = vadd.xlane.f32.xlu1 %v853_v31 }
 0x216   : > { %v2056_v33 = vpop.xlane.xlu1 %713 }
 0x217   : > { %v747_v36 = vsub.f32 %v1963_v28, %v2056_v33  ;;  %v748_v41 = vsub.f32 %v1968_v32, %v2056_v33 }
 0x219   : > { %v805_v46 = vmul.f32 1.442695, %v747_v36  ;;  %v807_v48 = vmul.f32 1.442695, %v748_v41 }
 0x21b   : > { %1343 = vpow2.f32 %v805_v46 }
 0x21c   : > { %1345 = vpow2.f32 %v807_v48 }
 0x21e   : > { %v2062_v52 = vpop.xlane.xlu2 %716  ;;  %v819_v53 = vpop.xlane.xlu1 %818 }
 0x21f   : > { %v749_v56 = vsub.f32 %v1977_v47, %v2062_v52  ;;  %v750_v58 = vsub.f32 %v1982_v51, %v2062_v52  ;;  %1347 = vlog2.f32 %v819_v53 }
 0x221   : > { %v1344_v3 = vpop.eup %1343  ;;  %v809_v4 = vmul.f32 1.442695, %v749_v56  ;;  %v811_v11 = vmul.f32 1.442695, %v750_v58 }
 0x222   : > { %v1346_v13 = vpop.eup %1345 }
 0x223   : > { %1349 = vpow2.f32 %v809_v4  ;;  %v856_v17 = vadd.f32 %v1346_v13, %v1344_v3 }
 0x224   : > { %1351 = vpow2.f32 %v811_v11 }
 0x225   : > { %v1348_v22 = vpop.eup %1347  ;;  %857 = vadd.xlane.f32.xlu2 %v856_v17 }
 0x226   : > { %v866_v6 = vmul.f32 0.6931472, %v1348_v22  ;;  %v822_v31 = vpop.xlane.xlu2 %821  ;;  %v2075_v36 = vpop.xlane.xlu0 %719 }
 0x227   : > { %1353 = vlog2.f32 %v822_v31  ;;  %v751_v41 = vsub.f32 %v1989_v63, %v2075_v36  ;;  %v752_v46 = vsub.f32 %v1998_v12, %v2075_v36 }
 0x228   : > { %v915_v48 = vadd.f32 %v899_v27, %v866_v6 }
 0x229   : > { %v1350_v53 = vpop.eup %1349  ;;  %v813_v56 = vmul.f32 1.442695, %v751_v41  ;;  %v815_v58 = vmul.f32 1.442695, %v752_v46 }
 0x22a   : > { %v1352_v3 = vpop.eup %1351  ;;  %vm931_vm1 = vcmp.ge.f32.partialorder %v1848_v9, %v915_v48  ;;  %vm932_vm2 = vcmp.ge.f32.partialorder %v1851_v10, %v915_v48  ;;  %v900_v9 = vadd.f32 %v2068_v18, %v1960_v26 }
 0x22b   : > { %v963_v4 = vsel %vm931_vm1, 1.0, %v1451_v16  ;;  %v964_v11 = vsel %vm932_vm2, 1.0, %v1451_v16  ;;  %1355 = vpow2.f32 %v813_v56  ;;  %v859_v13 = vadd.f32 %v1352_v3, %v1350_v53 }
 0x22c   : > { %995 = vst [vmem:[%s2085_s6] sm:$0xff] %v963_v4  ;;  %1357 = vpow2.f32 %v815_v58  ;;  %v901_v56 = vadd.f32 %v2068_v18, %v1974_v43 }
 0x22d   : > { %v1354_v17 = vpop.eup %1353  ;;  %996 = vst [vmem:[%s2085_s6 + $0x8] sm:$0xff] %v964_v11  ;;  %860 = vadd.xlane.f32.xlu0 %v859_v13 }
 0x22e   : > { %v868_v10 = vmul.f32 0.6931472, %v1354_v17  ;;  %v825_v22 = vpop.xlane.xlu0 %824 }
 0x22f   : > { %1359 = vlog2.f32 %v825_v22 }
 0x230   : > { %v916_v27 = vadd.f32 %v900_v9, %v868_v10  ;;  %v828_v6 = vpop.xlane.xlu1 %827 }
 0x231   : > { %v1356_v31 = vpop.eup %1355  ;;  %1361 = vlog2.f32 %v828_v6 }
 0x232   : > { %v1358_v41 = vpop.eup %1357  ;;  %vm933_vm3 = vcmp.ge.f32.partialorder %v1857_v14, %v916_v27  ;;  %vm934_vm4 = vcmp.ge.f32.partialorder %v1860_v15, %v916_v27  ;;  %v902_v14 = vadd.f32 %v2068_v18, %v1991_v2 }
 0x233   : > { %v965_v46 = vsel %vm933_vm3, 1.0, %v1451_v16  ;;  %v966_v48 = vsel %vm934_vm4, 1.0, %v1451_v16  ;;  %v862_v53 = vadd.f32 %v1358_v41, %v1356_v31 }
 0x234   : > { %997 = vst [vmem:[%s2085_s6 + $0x10] sm:$0xff] %v965_v46 }
 0x235   : > { %v1360_v26 = vpop.eup %1359  ;;  %998 = vst [vmem:[%s2085_s6 + $0x18] sm:$0xff] %v966_v48  ;;  %863 = vadd.xlane.f32.xlu1 %v862_v53 }
 0x236   : > { %v870_v58 = vmul.f32 0.6931472, %v1360_v26 }
 0x237   : > { %v1362_v3 = vpop.eup %1361 }
 0x238   : > { %v917_v15 = vadd.f32 %v901_v56, %v870_v58  ;;  %v872_v4 = vmul.f32 0.6931472, %v1362_v3  ;;  %v831_v11 = vpop.xlane.xlu2 %830 }
 0x239   : > { %1363 = vlog2.f32 %v831_v11 }
 0x23a   : > { %vm935_vm5 = vcmp.ge.f32.partialorder %v1867_v19, %v917_v15  ;;  %vm936_vm6 = vcmp.ge.f32.partialorder %v1870_v20, %v917_v15  ;;  %v918_v13 = vadd.f32 %v902_v14, %v872_v4  ;;  %v903_v20 = vadd.f32 %v2068_v18, %v2002_v23 }
 0x23b   : > { %v967_v17 = vsel %vm935_vm5, 1.0, %v1451_v16  ;;  %v968_v43 = vsel %vm936_vm6, 1.0, %v1451_v16  ;;  %v904_v23 = vadd.f32 %v2068_v18, %v2008_v42  ;;  %v905_v42 = vadd.f32 %v2068_v18, %v2014_v61 }
 0x23c   : > { %999 = vst [vmem:[%s2085_s6 + $0x20] sm:$0xff] %v967_v17  ;;  %vm937_vm7 = vcmp.ge.f32.partialorder %v1875_v24, %v918_v13  ;;  %vm938_vm8 = vcmp.ge.f32.partialorder %v1878_v25, %v918_v13  ;;  %v906_v61 = vadd.f32 %v2068_v18, %v2020_v5  ;;  %v907_v5 = vadd.f32 %v2068_v18, %v2026_v37 }
 0x23d   : > { %1000 = vst [vmem:[%s2085_s6 + $0x28] sm:$0xff] %v968_v43  ;;  %v969_v2 = vsel %vm937_vm7, 1.0, %v1451_v16  ;;  %v970_v9 = vsel %vm938_vm8, 1.0, %v1451_v16  ;;  %v908_v37 = vadd.f32 %v2068_v18, %v2032_v57  ;;  %v909_v57 = vadd.f32 %v2068_v18, %v2038_v21 }
 0x23e   : > { %1001 = vst [vmem:[%s2085_s6 + $0x30] sm:$0xff] %v969_v2  ;;  %v910_v21 = vadd.f32 %v2068_v18, %v2044_v38  ;;  %v911_v38 = vadd.f32 %v2068_v18, %v2050_v62  ;;  %v912_v62 = vadd.f32 %v2068_v18, %v2056_v33  ;;  %v913_v33 = vadd.f32 %v2068_v18, %v2062_v52 }
 0x23f   : > { %v1364_v19 = vpop.eup %1363  ;;  %1002 = vst [vmem:[%s2085_s6 + $0x38] sm:$0xff] %v970_v9 }
 0x240   : > { %v874_v10 = vmul.f32 0.6931472, %v1364_v19  ;;  %v834_v22 = vpop.xlane.xlu0 %833 }
 0x241   : > { %1365 = vlog2.f32 %v834_v22 }
 0x242   : > { %v919_v27 = vadd.f32 %v903_v20, %v874_v10 }
 0x244   : > { %vm939_vm9 = vcmp.ge.f32.partialorder %v1883_v29, %v919_v27  ;;  %vm940_vm10 = vcmp.ge.f32.partialorder %v1886_v30, %v919_v27 }
 0x245   : > { %v971_v24 = vsel %vm939_vm9, 1.0, %v1451_v16  ;;  %v972_v25 = vsel %vm940_vm10, 1.0, %v1451_v16 }
 0x246   : > { %1003 = vst [vmem:[%s2085_s6 + $0x40] sm:$0xff] %v971_v24 }
 0x247   : > { %v1366_v6 = vpop.eup %1365  ;;  %1004 = vst [vmem:[%s2085_s6 + $0x48] sm:$0xff] %v972_v25 }
 0x248   : > { %v876_v31 = vmul.f32 0.6931472, %v1366_v6  ;;  %v837_v41 = vpop.xlane.xlu1 %836 }
 0x249   : > { %1367 = vlog2.f32 %v837_v41 }
 0x24a   : > { %v920_v46 = vadd.f32 %v904_v23, %v876_v31 }
 0x24c   : > { %vm941_vm11 = vcmp.ge.f32.partialorder %v1891_v34, %v920_v46  ;;  %vm942_vm12 = vcmp.ge.f32.partialorder %v1894_v35, %v920_v46 }
 0x24d   : > { %v973_v29 = vsel %vm941_vm11, 1.0, %v1451_v16  ;;  %v974_v30 = vsel %vm942_vm12, 1.0, %v1451_v16 }
 0x24e   : > { %1005 = vst [vmem:[%s2085_s6 + $0x50] sm:$0xff] %v973_v29 }
 0x24f   : > { %v1368_v48 = vpop.eup %1367  ;;  %1006 = vst [vmem:[%s2085_s6 + $0x58] sm:$0xff] %v974_v30 }
 0x250   : > { %v878_v53 = vmul.f32 0.6931472, %v1368_v48  ;;  %v840_v26 = vpop.xlane.xlu2 %839 }
 0x251   : > { %1369 = vlog2.f32 %v840_v26 }
 0x252   : > { %v921_v56 = vadd.f32 %v905_v42, %v878_v53 }
 0x254   : > { %vm943_vm13 = vcmp.ge.f32.partialorder %v1899_v39, %v921_v56  ;;  %vm944_vm14 = vcmp.ge.f32.partialorder %v1902_v40, %v921_v56 }
 0x255   : > { %v975_v34 = vsel %vm943_vm13, 1.0, %v1451_v16  ;;  %v976_v35 = vsel %vm944_vm14, 1.0, %v1451_v16 }
 0x256   : > { %1007 = vst [vmem:[%s2085_s6 + $0x60] sm:$0xff] %v975_v34 }
 0x257   : > { %v1370_v58 = vpop.eup %1369  ;;  %1008 = vst [vmem:[%s2085_s6 + $0x68] sm:$0xff] %v976_v35 }
 0x258   : > { %v880_v3 = vmul.f32 0.6931472, %v1370_v58  ;;  %v843_v14 = vpop.xlane.xlu0 %842  ;;  %v914_v58 = vadd.f32 %v2068_v18, %v2075_v36 }
 0x259   : > { %1371 = vlog2.f32 %v843_v14 }
 0x25a   : > { %v922_v15 = vadd.f32 %v906_v61, %v880_v3 }
 0x25c   : > { %vm945_vm15 = vcmp.ge.f32.partialorder %v1907_v44, %v922_v15  ;;  %vm946_vm0 = vcmp.ge.f32.partialorder %v1910_v45, %v922_v15 }
 0x25d   : > { %v977_v39 = vsel %vm945_vm15, 1.0, %v1451_v16  ;;  %v978_v40 = vsel %vm946_vm0, 1.0, %v1451_v16 }
 0x25e   : > { %1009 = vst [vmem:[%s2085_s6 + $0x70] sm:$0xff] %v977_v39 }
 0x25f   : > { %v1372_v4 = vpop.eup %1371  ;;  %1010 = vst [vmem:[%s2085_s6 + $0x78] sm:$0xff] %v978_v40 }
 0x260   : > { %v882_v11 = vmul.f32 0.6931472, %v1372_v4  ;;  %v846_v13 = vpop.xlane.xlu1 %845 }
 0x261   : > { %1373 = vlog2.f32 %v846_v13 }
 0x262   : > { %v923_v17 = vadd.f32 %v907_v5, %v882_v11 }
 0x264   : > { %vm947_vm1 = vcmp.ge.f32.partialorder %v1915_v49, %v923_v17  ;;  %vm948_vm2 = vcmp.ge.f32.partialorder %v1918_v50, %v923_v17 }
 0x265   : > { %v979_v44 = vsel %vm947_vm1, 1.0, %v1451_v16  ;;  %v980_v45 = vsel %vm948_vm2, 1.0, %v1451_v16 }
 0x266   : > { %1011 = vst [vmem:[%s2085_s6 + $0x80] sm:$0xff] %v979_v44 }
 0x267   : > { %v1374_v43 = vpop.eup %1373  ;;  %1012 = vst [vmem:[%s2085_s6 + $0x88] sm:$0xff] %v980_v45 }
 0x268   : > { %v884_v2 = vmul.f32 0.6931472, %v1374_v43  ;;  %v849_v9 = vpop.xlane.xlu2 %848 }
 0x269   : > { %1375 = vlog2.f32 %v849_v9 }
 0x26a   : > { %v924_v19 = vadd.f32 %v908_v37, %v884_v2 }
 0x26c   : > { %vm949_vm3 = vcmp.ge.f32.partialorder %v1923_v54, %v924_v19  ;;  %vm950_vm4 = vcmp.ge.f32.partialorder %v1926_v55, %v924_v19 }
 0x26d   : > { %v981_v49 = vsel %vm949_vm3, 1.0, %v1451_v16  ;;  %v982_v50 = vsel %vm950_vm4, 1.0, %v1451_v16 }
 0x26e   : > { %1013 = vst [vmem:[%s2085_s6 + $0x90] sm:$0xff] %v981_v49 }
 0x26f   : > { %v1376_v20 = vpop.eup %1375  ;;  %1014 = vst [vmem:[%s2085_s6 + $0x98] sm:$0xff] %v982_v50 }
 0x270   : > { %v886_v10 = vmul.f32 0.6931472, %v1376_v20  ;;  %v852_v22 = vpop.xlane.xlu0 %851 }
 0x271   : > { %1377 = vlog2.f32 %v852_v22 }
 0x272   : > { %v925_v27 = vadd.f32 %v909_v57, %v886_v10 }
 0x274   : > { %vm951_vm5 = vcmp.ge.f32.partialorder %v1931_v59, %v925_v27  ;;  %vm952_vm6 = vcmp.ge.f32.partialorder %v1934_v60, %v925_v27 }
 0x275   : > { %v983_v54 = vsel %vm951_vm5, 1.0, %v1451_v16  ;;  %v984_v55 = vsel %vm952_vm6, 1.0, %v1451_v16 }
 0x276   : > { %1015 = vst [vmem:[%s2085_s6 + $0xa0] sm:$0xff] %v983_v54 }
 0x277   : > { %v1378_v24 = vpop.eup %1377  ;;  %1016 = vst [vmem:[%s2085_s6 + $0xa8] sm:$0xff] %v984_v55 }
 0x278   : > { %v888_v25 = vmul.f32 0.6931472, %v1378_v24  ;;  %v855_v6 = vpop.xlane.xlu1 %854 }
 0x279   : > { %1379 = vlog2.f32 %v855_v6 }
 0x27a   : > { %v926_v23 = vadd.f32 %v910_v21, %v888_v25 }
 0x27c   : > { %vm953_vm7 = vcmp.ge.f32.partialorder %v1939_v0, %v926_v23  ;;  %vm954_vm8 = vcmp.ge.f32.partialorder %v1942_v1, %v926_v23 }
 0x27d   : > { %v985_v59 = vsel %vm953_vm7, 1.0, %v1451_v16  ;;  %v986_v60 = vsel %vm954_vm8, 1.0, %v1451_v16 }
 0x27e   : > { %1017 = vst [vmem:[%s2085_s6 + $0xb0] sm:$0xff] %v985_v59 }
 0x27f   : > { %v1380_v31 = vpop.eup %1379  ;;  %1018 = vst [vmem:[%s2085_s6 + $0xb8] sm:$0xff] %v986_v60 }
 0x280   : > { %v890_v41 = vmul.f32 0.6931472, %v1380_v31 }
 0x282   : > { %v927_v46 = vadd.f32 %v911_v38, %v890_v41 }
 0x284   : > { %vm955_vm9 = vcmp.ge.f32.partialorder %v1947_v7, %v927_v46  ;;  %vm956_vm10 = vcmp.ge.f32.partialorder %v1950_v8, %v927_v46 }
 0x285   : > { %v987_v0 = vsel %vm955_vm9, 1.0, %v1451_v16  ;;  %v988_v1 = vsel %vm956_vm10, 1.0, %v1451_v16 }
 0x286   : > { %1019 = vst [vmem:[%s2085_s6 + $0xc0] sm:$0xff] %v987_v0 }
 0x287   : > { %1020 = vst [vmem:[%s2085_s6 + $0xc8] sm:$0xff] %v988_v1 }
 0x298   : > { %v858_v29 = vpop.xlane.xlu2 %857 }
 0x299   : > { %1381 = vlog2.f32 %v858_v29 }
 0x29f   : > { %v1382_v30 = vpop.eup %1381 }
 0x2a0   : > { %v892_v48 = vmul.f32 0.6931472, %v1382_v30  ;;  %v861_v42 = vpop.xlane.xlu0 %860 }
 0x2a1   : > { %1383 = vlog2.f32 %v861_v42 }
 0x2a2   : > { %v928_v7 = vadd.f32 %v912_v62, %v892_v48 }
 0x2a4   : > { %vm957_vm11 = vcmp.ge.f32.partialorder %v1963_v28, %v928_v7  ;;  %vm958_vm12 = vcmp.ge.f32.partialorder %v1968_v32, %v928_v7 }
 0x2a5   : > { %v989_v8 = vsel %vm957_vm11, 1.0, %v1451_v16  ;;  %v990_v53 = vsel %vm958_vm12, 1.0, %v1451_v16 }
 0x2a6   : > { %1021 = vst [vmem:[%s2085_s6 + $0xd0] sm:$0xff] %v989_v8 }
 0x2a7   : > { %v1384_v26 = vpop.eup %1383  ;;  %1022 = vst [vmem:[%s2085_s6 + $0xd8] sm:$0xff] %v990_v53 }
 0x2a8   : > { %v894_v56 = vmul.f32 0.6931472, %v1384_v26  ;;  %v864_v34 = vpop.xlane.xlu1 %863 }
 0x2a9   : > { %1385 = vlog2.f32 %v864_v34 }
 0x2aa   : > { %v929_v35 = vadd.f32 %v913_v33, %v894_v56 }
 0x2ac   : > { %vm959_vm13 = vcmp.ge.f32.partialorder %v1977_v47, %v929_v35  ;;  %vm960_vm14 = vcmp.ge.f32.partialorder %v1982_v51, %v929_v35 }
 0x2ad   : > { %v991_v28 = vsel %vm959_vm13, 1.0, %v1451_v16  ;;  %v992_v32 = vsel %vm960_vm14, 1.0, %v1451_v16 }
 0x2ae   : > { %1023 = vst [vmem:[%s2085_s6 + $0xe0] sm:$0xff] %v991_v28 }
 0x2af   : > { %v1386_v52 = vpop.eup %1385  ;;  %1024 = vst [vmem:[%s2085_s6 + $0xe8] sm:$0xff] %v992_v32 }
 0x2b0   : > { %v896_v47 = vmul.f32 0.6931472, %v1386_v52 }
 0x2b2   : > { %v930_v51 = vadd.f32 %v914_v58, %v896_v47 }
 0x2b4   : > { %vm961_vm15 = vcmp.ge.f32.partialorder %v1989_v63, %v930_v51  ;;  %vm962_vm0 = vcmp.ge.f32.partialorder %v1998_v12, %v930_v51 }
 0x2b5   : > { %v993_v61 = vsel %vm961_vm15, 1.0, %v1451_v16  ;;  %v994_v3 = vsel %vm962_vm0, 1.0, %v1451_v16 }
 0x2b6   : > { %1025 = vst [vmem:[%s2085_s6 + $0xf0] sm:$0xff] %v993_v61 }
 0x2b7   : > { %1026 = vst [vmem:[%s2085_s6 + $0xf8] sm:$0xff] %v994_v3 }
 0x2b8   : > { %1414 = shalt.err (!%p1411_p3)
}
 0x2b9   : > { %s1452_s24 = smov 256   ;;  %s1453_s26 = smov 16  }
 0x2ba   : > { %1249 = dma.vmem_to_hbm [thread:$0]  (%p1525_p5), %s1042_s4, 4096, %s1044_s11, %s1028_s12, %s1452_s24, %s1452_s24, %s1453_s26  }
 0x2bb PF: > { %p1255_p4 = scmp.ge.s32.totalorder %s1449_s23, 2  ;;  %s1058_s27 = sand.u32 1, %s1437_s20  }
 0x2bc   : > { %s1059_s6 = scalar_lea.sflag [#allocation4], %s1058_s27 }
 0x2bd   : > { %p1252_p7 = pnand %p1255_p4, %p1529_p6 }
 0x2bf   : > { %p1253_p8 = pneg %p1252_p7 }
 0x2c1   : > { %1432 = dma.done.wait (%p1253_p8), %s1059_s6, 4096  }
 0x2c2   : > { %1434 = vsyncadd (%p1253_p8), %s1059_s6, 4294963200  ;;  %p16_p9 = scmp.ge.s32.totalorder %s1512_s25, 4   ;;  %s2251_s20 = smov %s1441_s21 }
 0x2c3   : > { %s2252_s21 = smov %s1445_s22  ;;  %s2253_s22 = smov %s1523_s28 }
 0x2c4   : > { %s2254_s23 = smov %s1512_s25  ;;  %18 = sbr.rel (!%p16_p9) target bundleno = 5 (0x5), region = 75 }
 0x2c9   :  { %1065 = vsyncpa [#allocation4], 1 }
 0x2ca   :  { %1067 = vsyncpa [#allocation4 + $0x1], 1 }

// kernel: tpu_custom_call.1
= control target key start
LH: loop header
LB: loop body
LE: loop exit
PB: predicated region body
PF: predicated region fallthrough
CT: control target
= control target key end

     0   :  { %s2243_s0 = inlined_call_operand.vmem [shape: f32[256,32], index: 0, kind: input, shape index: {}]   ;;  %s2244_s1 = inlined_call_operand.vmem [shape: f32[256,32], index: 1, kind: input, shape index: {}]   ;;  %s2245_s2 = inlined_call_operand.vmem [shape: f32[32,32], index: 2, kind: input, shape index: {}]   ;;  %s2246_s3 = inlined_call_operand.vmem [shape: f32[1,256], index: 3, kind: input, shape index: {}]   ;;  %s2247_s4 = inlined_call_operand.<no memory space> [shape: f32[1], index: 4, kind: input, shape index: {}]   ;;  %s2248_s5 = inlined_call_operand.hbm [shape: f32[256,256], index: 5, kind: output, shape index: {}]  }
   0x1   :  { %10 = sst [smem:[#allocation2]] %s2247_s4 }
   0x2   :  { %11 = vsyncpa [#allocation4], 0 }
   0x3   :  { %13 = vsyncpa [#allocation4 + $0x1], 0  ;;  %s1487_s20 = smov 0   ;;  %s1489_s21 = smov 0  }
   0x4   :  { %s1491_s22 = smov 0   ;;  %s1493_s23 = smov 0  }
   0x5 LB: > { %s1508_s4 = sadd.s32 4294967295, %s1449_s23   ;;  %s1106_s24 = sadd.s32 4294967294, %s1449_s23   ;;  %s1449_s23 = sphi %s1493_s23, %s2254_s23   ;;  %s1445_s22 = sphi %s1491_s22, %s2253_s22   ;;  %s1441_s21 = sphi %s1489_s21, %s2252_s21   ;;  %s1437_s20 = sphi %s1487_s20, %s2251_s20  }
   0x6   : > { %s1512_s25 = sadd.s32 1, %s1449_s23   ;;  %s136_s26 = sadd.s32 1, %s1445_s22 }
   0x7   : > { %s133_s27 = ssub.s32 %s1449_s23, %s1512_s25  ;;  %p146_p0 = scmp.ne.s32.totalorder %s1445_s22, %s1441_s21 }
   0x8   : > { %p134_p1 = scmp.eq.s32.totalorder %s133_s27, 0  ;;  %p147_p2 = scmp.eq.s32.totalorder %s1508_s4, 1 }
   0x9   : > { %p152_p3 = scmp.ne.s32.totalorder %s1441_s21, %s1437_s20  ;;  %p153_p4 = scmp.eq.s32.totalorder %s1106_s24, 1 }
   0xa   : > { %s1523_s28 = scalar_select %p134_p1, %s1445_s22, %s136_s26  }
   0xb   : > { %p1525_p5 = por %p147_p2, %p146_p0  ;;  %p1529_p6 = por %p153_p4, %p152_p3 }
   0xc   : > { %p1109_p7 = scmp.ge.s32.totalorder %s1449_s23, 1  ;;  %p192_p8 = scmp.lt.s32.totalorder %s1449_s23, 3 }
   0xe   : > { %p193_p9 = pnand %p1109_p7, %p192_p8 }
   0xf   : > { %s1111_s10 = sshll.u32 (!%p193_p9), %s1508_s4, 4  ;;  %s897_s24 = sld [smem:[#allocation2]] (!%p193_p9) }
  0x10   : > { %196 = sbr.rel (%p193_p9) target bundleno = 699 (0x2bb), region = 40  ;;  %p221_p10 = scmp.lt.s32.totalorder (!%p193_p9), %s1111_s10, 31 }
  0x11   : > { %s217_s26 = sand.u32 (!%p193_p9), 1, %s1441_s21   ;;  %s1200_s7 = sshll.u32 (!%p193_p9), %s1508_s4, 8 }
  0x12   : > { %s1110_s27 = sshll.u32 (!%p193_p9), %s217_s26, 8  ;;  %s1028_s12 = scalar_lea.sflag (!%p193_p9), [#allocation4], %s217_s26 }
  0x13   : > { %s2085_s6 = scalar_lea.vmem (!%p193_p9), [#allocation3], %s1110_s27  ;;  %s1407_s17 = scalar_lea.hbm (!%p193_p9), %s2248_s5, 512 }
  0x14   : > { %s1041_s4 = sshll.u32 (!%p193_p9), %s2085_s6, 4  ;;  %s1042_s4 = int_to_ptr.vmem [resolvable:$true] %s1041_s4 }
  0x15   : > { %v246_v0 = vld [vmem:[%s2245_s2 + $0x18] sm:$0xff]  ;;  %v245_v1 = vld [vmem:[%s2245_s2 + $0x10] sm:$0xff]  ;;  %v244_v2 = vld [vmem:[%s2245_s2 + $0x8] sm:$0xff]  ;;  %s2256_s10 = smov (!%p221_p10, %s1111_s10), 31  ;;  %vm247_vm0 = vcmask 261120  }
  0x16   : > { %308 = vmatpush.msra.mxu0 %v246_v0  ;;  %v243_v3 = vld [vmem:[%s2245_s2] sm:$0xff]  ;;  %s1112_s15 = sshll.u32 %s2256_s10, 3  ;;  %v376_v8 = vld [vmem:[%s2244_s1 + $0x78] sm:$0xff]  ;;  %v375_v11 = vld [vmem:[%s2244_s1 + $0x70] sm:$0xff]  ;;  %s1040_s10 = scalar_lea.hbm %s2248_s5, %s1200_s7 }
  0x17   : > { %s1551_s18 = scalar_lea.vmem %s2243_s0, %s1112_s15  ;;  %1129 = vmatpush.xpose.msk.msra.mxu1 %vm247_vm0, %v376_v8  ;;  %1201 = vmatpush.xpose.msk.msra.mxu3 %vm247_vm0, %v376_v8  ;;  %v1571_v10 = vld [vmem:[%s2244_s1 + $0xf8] sm:$0xff]  ;;  %v1582_v12 = vld [vmem:[%s2244_s1 + $0xf0] sm:$0xff]  ;;  %v374_v13 = vld [vmem:[%s2244_s1 + $0x68] sm:$0xff]  ;;  %s1043_s11 = sshll.u32 %s1040_s10, 4  ;;  %s1044_s11 = int_to_ptr.hbm [resolvable:$true] %s1043_s11 }
  0x18   : > { %309 = vmatpush.msra.mxu0 %v245_v1  ;;  %v227_v4 = vld [vmem:[%s1551_s18] sm:$0xff]  ;;  %v228_v5 = vld [vmem:[%s1551_s18 + $0x8] sm:$0xff]  ;;  %v229_v6 = vld [vmem:[%s1551_s18 + $0x10] sm:$0xff]  ;;  %1217 = vmatpush.xpose.msk.msra.mxu2 %vm247_vm0, %v1571_v10  ;;  %s1401_s13 = sshra.s32 %s1044_s11, 4  ;;  %s1402_s13 = int_to_ptr.hbm [resolvable:$true] %s1401_s13 }
  0x19   : > { %v230_v7 = vld [vmem:[%s1551_s18 + $0x18] sm:$0xff]  ;;  %v231_v9 = vld [vmem:[%s1551_s18 + $0x20] sm:$0xff]  ;;  %v232_v14 = vld [vmem:[%s1551_s18 + $0x28] sm:$0xff]  ;;  %s1403_s14 = scalar_lea.hbm %s1402_s13, 256  ;;  %p1408_p0 = scmp.lt.s32.totalorder %s1402_s13, %s2248_s5 }
  0x1a   : > { %310 = vmatpush.msra.mxu0 %v244_v2  ;;  %v1601_v15 = vld [vmem:[%s2244_s1 + $0xe8] sm:$0xff]  ;;  %v373_v16 = vld [vmem:[%s2244_s1 + $0x60] sm:$0xff]  ;;  %v372_v18 = vld [vmem:[%s2244_s1 + $0x58] sm:$0xff]  ;;  %p1404_p11 = scmp.ne.s32.totalorder %s1402_s13, %s1403_s14  ;;  %p1409_p1 = scmp.lt.s32.totalorder %s1407_s17, %s1403_s14 }
  0x1b   : > { %1130 = vmatpush.xpose.msk.msra.mxu1 %vm247_vm0, %v375_v11  ;;  %1202 = vmatpush.xpose.msk.msra.mxu3 %vm247_vm0, %v375_v11  ;;  %v1612_v17 = vld [vmem:[%s2244_s1 + $0xe0] sm:$0xff]  ;;  %v233_v19 = vld [vmem:[%s1551_s18 + $0x30] sm:$0xff]  ;;  %v1631_v20 = vld [vmem:[%s2244_s1 + $0xd8] sm:$0xff] }
  0x1c   : > { %311 = vmatpush.msra.mxu0 %v243_v3  ;;  %1219 = vmatpush.xpose.msk.msra.mxu2 %vm247_vm0, %v1582_v12  ;;  %v371_v21 = vld [vmem:[%s2244_s1 + $0x50] sm:$0xff]  ;;  %v370_v23 = vld [vmem:[%s2244_s1 + $0x48] sm:$0xff]  ;;  %v234_v24 = vld [vmem:[%s1551_s18 + $0x38] sm:$0xff]  ;;  %p1405_p12 = pnand %p1404_p11, %p1525_p5  ;;  %p1410_p2 = por %p1409_p1, %p1408_p0 }
  0x1d   : > { %1113 = vmatmul.msk.f32.vlgmr.msra.gmra.mxu0 %vm247_vm0, %v227_v4  ;;  %v1642_v22 = vld [vmem:[%s2244_s1 + $0xd0] sm:$0xff]  ;;  %v1661_v25 = vld [vmem:[%s2244_s1 + $0xc8] sm:$0xff]  ;;  %v369_v26 = vld [vmem:[%s2244_s1 + $0x40] sm:$0xff] }
  0x1e   : > { %1161 = vmatpush.xpose.msk.msrb.mxu0 %vm247_vm0, %v1571_v10  ;;  %v1672_v27 = vld [vmem:[%s2244_s1 + $0xc0] sm:$0xff]  ;;  %v368_v28 = vld [vmem:[%s2244_s1 + $0x38] sm:$0xff]  ;;  %v367_v31 = vld [vmem:[%s2244_s1 + $0x30] sm:$0xff]  ;;  %p1406_p13 = pneg %p1405_p12 }
  0x1f   : > { %1131 = vmatpush.xpose.msk.msra.mxu1 %vm247_vm0, %v374_v13  ;;  %1203 = vmatpush.xpose.msk.msra.mxu3 %vm247_vm0, %v374_v13  ;;  %v235_v29 = vld [vmem:[%s1551_s18 + $0x40] sm:$0xff]  ;;  %v1691_v30 = vld [vmem:[%s2244_s1 + $0xb8] sm:$0xff]  ;;  %v1702_v32 = vld [vmem:[%s2244_s1 + $0xb0] sm:$0xff] }
  0x20   : > { %1221 = vmatpush.xpose.msk.msra.mxu2 %vm247_vm0, %v1601_v15  ;;  %v366_v33 = vld [vmem:[%s2244_s1 + $0x28] sm:$0xff]  ;;  %v365_v36 = vld [vmem:[%s2244_s1 + $0x20] sm:$0xff]  ;;  %v364_v38 = vld [vmem:[%s2244_s1 + $0x18] sm:$0xff]  ;;  %p1411_p3 = pnand %p1410_p2, %p1406_p13 }
  0x21   : > { %v236_v34 = vld [vmem:[%s1551_s18 + $0x48] sm:$0xff]  ;;  %v381_v37 = vld [vmem:[%s2244_s1 + $0xa0] sm:$0xff]  ;;  %v237_v39 = vld [vmem:[%s1551_s18 + $0x50] sm:$0xff] }
  0x22   : > { %1162 = vmatpush.xpose.msk.msrb.mxu0 %vm247_vm0, %v1582_v12  ;;  %v382_v35 = vld [vmem:[%s2244_s1 + $0xa8] sm:$0xff]  ;;  %v380_v40 = vld [vmem:[%s2244_s1 + $0x98] sm:$0xff]  ;;  %v363_v41 = vld [vmem:[%s2244_s1 + $0x10] sm:$0xff] }
  0x23   : > { %1132 = vmatpush.xpose.msk.msra.mxu1 %vm247_vm0, %v373_v16  ;;  %1204 = vmatpush.xpose.msk.msra.mxu3 %vm247_vm0, %v373_v16  ;;  %v379_v42 = vld [vmem:[%s2244_s1 + $0x90] sm:$0xff]  ;;  %v362_v43 = vld [vmem:[%s2244_s1 + $0x8] sm:$0xff]  ;;  %v238_v44 = vld [vmem:[%s1551_s18 + $0x58] sm:$0xff] }
  0x24   : > { %1223 = vmatpush.xpose.msk.msra.mxu2 %vm247_vm0, %v1612_v17  ;;  %v378_v45 = vld [vmem:[%s2244_s1 + $0x88] sm:$0xff]  ;;  %v361_v46 = vld [vmem:[%s2244_s1] sm:$0xff]  ;;  %v241_v50 = vld [vmem:[%s1551_s18 + $0x70] sm:$0xff] }
  0x25   : > { %1114 = vmatmul.msk.f32.gmra.mxu0 %vm247_vm0, %v228_v5  ;;  %v377_v47 = vld [vmem:[%s2244_s1 + $0x80] sm:$0xff]  ;;  %v240_v49 = vld [vmem:[%s1551_s18 + $0x68] sm:$0xff]  ;;  %v242_v51 = vld [vmem:[%s1551_s18 + $0x78] sm:$0xff] }
  0x26   : > { %1163 = vmatpush.xpose.msk.msrb.mxu0 %vm247_vm0, %v1601_v15  ;;  %v239_v48 = vld [vmem:[%s1551_s18 + $0x60] sm:$0xff] }
  0x27   : > { %1133 = vmatpush.xpose.msk.msra.mxu1 %vm247_vm0, %v372_v18  ;;  %1205 = vmatpush.xpose.msk.msra.mxu3 %vm247_vm0, %v372_v18  ;;  %v393_v4 = vld [vmem:[%s2246_s3] sm:$0x3] }
  0x28   : > { %1225 = vmatpush.xpose.msk.msra.mxu2 %vm247_vm0, %v1631_v20  ;;  %v1843_v5 = vperm.slane %v393_v4, 0 }
  0x2a   : > { %1164 = vmatpush.xpose.msk.msrb.mxu0 %vm247_vm0, %v1612_v17 }
  0x2b   : > { %1134 = vmatpush.xpose.msk.msra.mxu1 %vm247_vm0, %v371_v21  ;;  %1206 = vmatpush.xpose.msk.msra.mxu3 %vm247_vm0, %v371_v21 }
  0x2c   : > { %1227 = vmatpush.xpose.msk.msra.mxu2 %vm247_vm0, %v1642_v22 }
  0x2d   : > { %1115 = vmatmul.msk.f32.gmra.mxu0 %vm247_vm0, %v229_v6  ;;  %v1845_v6 = vperm.slane %v393_v4, 1 }
  0x2e   : > { %1165 = vmatpush.xpose.msk.msrb.mxu0 %vm247_vm0, %v1631_v20 }
  0x2f   : > { %1135 = vmatpush.xpose.msk.msra.mxu1 %vm247_vm0, %v370_v23  ;;  %1207 = vmatpush.xpose.msk.msra.mxu3 %vm247_vm0, %v370_v23 }
  0x30   : > { %1229 = vmatpush.xpose.msk.msra.mxu2 %vm247_vm0, %v1661_v25 }
  0x32   : > { %1166 = vmatpush.xpose.msk.msrb.mxu0 %vm247_vm0, %v1642_v22 }
  0x33   : > { %1136 = vmatpush.xpose.msk.msra.mxu1 %vm247_vm0, %v369_v26  ;;  %1208 = vmatpush.xpose.msk.msra.mxu3 %vm247_vm0, %v369_v26 }
  0x34   : > { %1231 = vmatpush.xpose.msk.msra.mxu2 %vm247_vm0, %v1672_v27 }
  0x35   : > { %1116 = vmatmul.msk.f32.gmra.mxu0 %vm247_vm0, %v230_v7 }
  0x36   : > { %1167 = vmatpush.xpose.msk.msrb.mxu0 %vm247_vm0, %v1661_v25 }
  0x37   : > { %1137 = vmatpush.xpose.msk.msra.mxu1 %vm247_vm0, %v368_v28  ;;  %1209 = vmatpush.xpose.msk.msra.mxu3 %vm247_vm0, %v368_v28 }
  0x38   : > { %1233 = vmatpush.xpose.msk.msra.mxu2 %vm247_vm0, %v1691_v30 }
  0x3a   : > { %1168 = vmatpush.xpose.msk.msrb.mxu0 %vm247_vm0, %v1672_v27 }
  0x3b   : > { %1138 = vmatpush.xpose.msk.msra.mxu1 %vm247_vm0, %v367_v31  ;;  %1210 = vmatpush.xpose.msk.msra.mxu3 %vm247_vm0, %v367_v31 }
  0x3c   : > { %1235 = vmatpush.xpose.msk.msra.mxu2 %vm247_vm0, %v1702_v32 }
  0x3d   : > { %1117 = vmatmul.msk.f32.gmra.mxu0 %vm247_vm0, %v231_v9 }
  0x3e   : > { %1169 = vmatpush.xpose.msk.msrb.mxu0 %vm247_vm0, %v1691_v30 }
  0x3f   : > { %1139 = vmatpush.xpose.msk.msra.mxu1 %vm247_vm0, %v366_v33  ;;  %1211 = vmatpush.xpose.msk.msra.mxu3 %vm247_vm0, %v366_v33 }
  0x40   : > { %1237 = vmatpush.xpose.msk.msra.mxu2 %vm247_vm0, %v382_v35 }
  0x42   : > { %1170 = vmatpush.xpose.msk.msrb.mxu0 %vm247_vm0, %v1702_v32 }
  0x43   : > { %1140 = vmatpush.xpose.msk.msra.mxu1 %vm247_vm0, %v365_v36  ;;  %1212 = vmatpush.xpose.msk.msra.mxu3 %vm247_vm0, %v365_v36 }
  0x44   : > { %1239 = vmatpush.xpose.msk.msra.mxu2 %vm247_vm0, %v381_v37 }
  0x45   : > { %1118 = vmatmul.msk.f32.gmra.mxu0 %vm247_vm0, %v232_v14 }
  0x46   : > { %1171 = vmatpush.xpose.msk.msrb.mxu0 %vm247_vm0, %v382_v35 }
  0x47   : > { %1141 = vmatpush.xpose.msk.msra.mxu1 %vm247_vm0, %v364_v38  ;;  %1213 = vmatpush.xpose.msk.msra.mxu3 %vm247_vm0, %v364_v38 }
  0x48   : > { %1241 = vmatpush.xpose.msk.msra.mxu2 %vm247_vm0, %v380_v40 }
  0x4a   : > { %1172 = vmatpush.xpose.msk.msrb.mxu0 %vm247_vm0, %v381_v37 }
  0x4b   : > { %1142 = vmatpush.xpose.msk.msra.mxu1 %vm247_vm0, %v363_v41  ;;  %1214 = vmatpush.xpose.msk.msra.mxu3 %vm247_vm0, %v363_v41 }
  0x4c   : > { %1243 = vmatpush.xpose.msk.msra.mxu2 %vm247_vm0, %v379_v42 }
  0x4d   : > { %1119 = vmatmul.msk.f32.gmra.mxu0 %vm247_vm0, %v233_v19 }
  0x4e   : > { %1173 = vmatpush.xpose.msk.msrb.mxu0 %vm247_vm0, %v380_v40 }
  0x4f   : > { %1143 = vmatpush.xpose.msk.msra.mxu1 %vm247_vm0, %v362_v43  ;;  %1215 = vmatpush.xpose.msk.msra.mxu3 %vm247_vm0, %v362_v43 }
  0x50   : > { %1245 = vmatpush.xpose.msk.msra.mxu2 %vm247_vm0, %v378_v45 }
  0x52   : > { %1174 = vmatpush.xpose.msk.msrb.mxu0 %vm247_vm0, %v379_v42 }
  0x53   : > { %1144 = vmatpush.xpose.msk.msra.mxu1 %vm247_vm0, %v361_v46  ;;  %1216 = vmatpush.xpose.msk.msra.mxu3 %vm247_vm0, %v361_v46 }
  0x54   : > { %1247 = vmatpush.xpose.msk.msra.mxu2 %vm247_vm0, %v377_v47 }
  0x55   : > { %1120 = vmatmul.msk.f32.gmra.mxu0 %vm247_vm0, %v234_v24 }
  0x56   : > { %1175 = vmatpush.xpose.msk.msrb.mxu0 %vm247_vm0, %v378_v45 }
  0x57   : > { %1218 = vmatpush.xpose.msk.msrb.mxu3 %vm247_vm0, %v1571_v10 }
  0x5a   : > { %1176 = vmatpush.xpose.msk.msrb.mxu0 %vm247_vm0, %v377_v47 }
  0x5b   : > { %1220 = vmatpush.xpose.msk.msrb.mxu3 %vm247_vm0, %v1582_v12 }
  0x5d   : > { %1121 = vmatmul.msk.f32.gmra.mxu0 %vm247_vm0, %v235_v29 }
  0x5f   : > { %1222 = vmatpush.xpose.msk.msrb.mxu3 %vm247_vm0, %v1601_v15 }
  0x63   : > { %1224 = vmatpush.xpose.msk.msrb.mxu3 %vm247_vm0, %v1612_v17 }
  0x65   : > { %1122 = vmatmul.msk.f32.gmra.mxu0 %vm247_vm0, %v236_v34 }
  0x67   : > { %1226 = vmatpush.xpose.msk.msrb.mxu3 %vm247_vm0, %v1631_v20 }
  0x6b   : > { %1228 = vmatpush.xpose.msk.msrb.mxu3 %vm247_vm0, %v1642_v22 }
  0x6d   : > { %1123 = vmatmul.msk.f32.gmra.mxu0 %vm247_vm0, %v237_v39 }
  0x6f   : > { %1230 = vmatpush.xpose.msk.msrb.mxu3 %vm247_vm0, %v1661_v25 }
  0x73   : > { %1232 = vmatpush.xpose.msk.msrb.mxu3 %vm247_vm0, %v1672_v27 }
  0x75   : > { %1124 = vmatmul.msk.f32.gmra.mxu0 %vm247_vm0, %v238_v44 }
  0x77   : > { %1234 = vmatpush.xpose.msk.msrb.mxu3 %vm247_vm0, %v1691_v30 }
  0x7b   : > { %1236 = vmatpush.xpose.msk.msrb.mxu3 %vm247_vm0, %v1702_v32 }
  0x7d   : > { %1125 = vmatmul.msk.f32.gmra.mxu0 %vm247_vm0, %v239_v48 }
  0x7f   : > { %1238 = vmatpush.xpose.msk.msrb.mxu3 %vm247_vm0, %v382_v35 }
  0x83   : > { %1240 = vmatpush.xpose.msk.msrb.mxu3 %vm247_vm0, %v381_v37 }
  0x85   : > { %1126 = vmatmul.msk.f32.gmra.mxu0 %vm247_vm0, %v240_v49 }
  0x87   : > { %1242 = vmatpush.xpose.msk.msrb.mxu3 %vm247_vm0, %v380_v40 }
  0x8b   : > { %1244 = vmatpush.xpose.msk.msrb.mxu3 %vm247_vm0, %v379_v42 }
  0x8d   : > { %1127 = vmatmul.msk.f32.gmra.mxu0 %vm247_vm0, %v241_v50 }
  0x8f   : > { %1246 = vmatpush.xpose.msk.msrb.mxu3 %vm247_vm0, %v378_v45 }
  0x93   : > { %1248 = vmatpush.xpose.msk.msrb.mxu3 %vm247_vm0, %v377_v47 }
  0x95   : > { %1128 = vmatmul.msk.f32.gmra.mxu0 %vm247_vm0, %v242_v51 }
  0x9a   : > { %v313_v52 = vpop.f32.mrf.mxu0 }
  0x9b   : > { %1145 = vmatmul.msk.f32.vlgmr.msra.gmra.mxu1 %vm247_vm0, %v313_v52 }
  0x9d   : > { %1177 = vmatmul.msk.f32.vlgmr.msrb.gmra.mxu0 %vm247_vm0, %v313_v52 }
  0xa2   : > { %v316_v53 = vpop.f32.mrf.mxu0 }
  0xa3   : > { %1146 = vmatmul.msk.f32.gmra.mxu1 %vm247_vm0, %v316_v53 }
  0xa5   : > { %1178 = vmatmul.msk.f32.gmra.mxu0 %vm247_vm0, %v316_v53 }
  0xaa   : > { %v319_v54 = vpop.f32.mrf.mxu0 }
  0xab   : > { %1147 = vmatmul.msk.f32.gmra.mxu1 %vm247_vm0, %v319_v54  ;;  %1179 = vmatmul.msk.f32.vlgmr.msra.gmra.mxu2 %vm247_vm0, %v319_v54 }
  0xb2   : > { %v322_v55 = vpop.f32.mrf.mxu0 }
  0xb3   : > { %1148 = vmatmul.msk.f32.gmra.mxu1 %vm247_vm0, %v322_v55  ;;  %1180 = vmatmul.msk.f32.gmra.mxu2 %vm247_vm0, %v322_v55 }
  0xba   : > { %v325_v56 = vpop.f32.mrf.mxu0 }
  0xbb   : > { %1149 = vmatmul.msk.f32.gmra.mxu1 %vm247_vm0, %v325_v56  ;;  %1181 = vmatmul.msk.f32.gmra.mxu2 %vm247_vm0, %v325_v56 }
  0xc2   : > { %v328_v57 = vpop.f32.mrf.mxu0 }
  0xc3   : > { %1150 = vmatmul.msk.f32.gmra.mxu1 %vm247_vm0, %v328_v57  ;;  %1182 = vmatmul.msk.f32.gmra.mxu2 %vm247_vm0, %v328_v57 }
  0xca   : > { %v331_v58 = vpop.f32.mrf.mxu0 }
  0xcb   : > { %1151 = vmatmul.msk.f32.gmra.mxu1 %vm247_vm0, %v331_v58  ;;  %1183 = vmatmul.msk.f32.gmra.mxu2 %vm247_vm0, %v331_v58 }
  0xd2   : > { %v334_v59 = vpop.f32.mrf.mxu0 }
  0xd3   : > { %1152 = vmatmul.msk.f32.gmra.mxu1 %vm247_vm0, %v334_v59  ;;  %1184 = vmatmul.msk.f32.gmra.mxu2 %vm247_vm0, %v334_v59 }
  0xda   : > { %v337_v60 = vpop.f32.mrf.mxu0 }
  0xdb   : > { %1153 = vmatmul.msk.f32.gmra.mxu1 %vm247_vm0, %v337_v60  ;;  %1185 = vmatmul.msk.f32.gmra.mxu2 %vm247_vm0, %v337_v60 }
  0xe2   : > { %v340_v61 = vpop.f32.mrf.mxu0 }
  0xe3   : > { %1154 = vmatmul.msk.f32.gmra.mxu1 %vm247_vm0, %v340_v61  ;;  %1186 = vmatmul.msk.f32.gmra.mxu2 %vm247_vm0, %v340_v61 }
  0xea   : > { %v343_v62 = vpop.f32.mrf.mxu0 }
  0xeb   : > { %1155 = vmatmul.msk.f32.gmra.mxu1 %vm247_vm0, %v343_v62  ;;  %1187 = vmatmul.msk.f32.gmra.mxu2 %vm247_vm0, %v343_v62 }
  0xf2   : > { %v346_v63 = vpop.f32.mrf.mxu0 }
  0xf3   : > { %1156 = vmatmul.msk.f32.vlgmr.msra.gmra.mxu3 %vm247_vm0, %v346_v63  ;;  %1188 = vmatmul.msk.f32.gmra.mxu2 %vm247_vm0, %v346_v63 }
  0xfa   : > { %v349_v0 = vpop.f32.mrf.mxu0 }
  0xfb   : > { %1157 = vmatmul.msk.f32.gmra.mxu3 %vm247_vm0, %v349_v0  ;;  %1189 = vmatmul.msk.f32.gmra.mxu2 %vm247_vm0, %v349_v0 }
 0x102   : > { %v352_v1 = vpop.f32.mrf.mxu0 }
 0x103   : > { %1158 = vmatmul.msk.f32.gmra.mxu3 %vm247_vm0, %v352_v1 }
 0x10a   : > { %v355_v2 = vpop.f32.mrf.mxu0 }
 0x10b   : > { %1159 = vmatmul.msk.f32.gmra.mxu3 %vm247_vm0, %v355_v2 }
 0x112   : > { %v358_v3 = vpop.f32.mrf.mxu0 }
 0x113   : > { %1160 = vmatmul.msk.f32.gmra.mxu3 %vm247_vm0, %v358_v3 }
 0x118   : > { %v560_v7 = vpop.f32.mrf.mxu1 }
 0x119   : > { %v1848_v9 = vadd.f32 %v560_v7, %v1843_v5 }
 0x11a   : > { %v625_v8 = vpop.f32.mrf.mxu0 }
 0x11b   : > { %v1851_v10 = vadd.f32 %v625_v8, %v1845_v6  ;;  %1190 = vmatmul.msk.f32.vlgmr.msrb.gmra.mxu3 %vm247_vm0, %v352_v1 }
 0x11d   : > { %v673_v11 = vmax.f32 %v1848_v9, %v1851_v10 }
 0x11f   : > { %674 = vmax.xlane.f32.xlu0 %v673_v11 }
 0x120   : > { %v563_v12 = vpop.f32.mrf.mxu1 }
 0x121   : > { %v1857_v14 = vadd.f32 %v563_v12, %v1843_v5 }
 0x122   : > { %v628_v13 = vpop.f32.mrf.mxu0 }
 0x123   : > { %v1860_v15 = vadd.f32 %v628_v13, %v1845_v6  ;;  %1191 = vmatmul.msk.f32.gmra.mxu3 %vm247_vm0, %v355_v2 }
 0x125   : > { %v676_v16 = vmax.f32 %v1857_v14, %v1860_v15 }
 0x127   : > { %677 = vmax.xlane.f32.xlu0 %v676_v16 }
 0x128   : > { %v566_v17 = vpop.f32.mrf.mxu1 }
 0x129   : > { %v1867_v19 = vadd.f32 %v566_v17, %v1843_v5 }
 0x12b   : > { %1192 = vmatmul.msk.f32.gmra.mxu3 %vm247_vm0, %v358_v3 }
 0x12e   : > { %v631_v18 = vpop.f32.mrf.mxu2 }
 0x12f   : > { %v1870_v20 = vadd.f32 %v631_v18, %v1845_v6 }
 0x130   : > { %v569_v21 = vpop.f32.mrf.mxu1 }
 0x131   : > { %v679_v22 = vmax.f32 %v1867_v19, %v1870_v20  ;;  %v1875_v24 = vadd.f32 %v569_v21, %v1843_v5 }
 0x133   : > { %680 = vmax.xlane.f32.xlu1 %v679_v22 }
 0x136   : > { %v634_v23 = vpop.f32.mrf.mxu2 }
 0x137   : > { %v1878_v25 = vadd.f32 %v634_v23, %v1845_v6 }
 0x138   : > { %v572_v26 = vpop.f32.mrf.mxu1 }
 0x139   : > { %v682_v27 = vmax.f32 %v1875_v24, %v1878_v25  ;;  %v1883_v29 = vadd.f32 %v572_v26, %v1843_v5 }
 0x13b   : > { %683 = vmax.xlane.f32.xlu1 %v682_v27 }
 0x13e   : > { %v637_v28 = vpop.f32.mrf.mxu2 }
 0x13f   : > { %v1886_v30 = vadd.f32 %v637_v28, %v1845_v6 }
 0x140   : > { %v575_v31 = vpop.f32.mrf.mxu1 }
 0x141   : > { %v685_v32 = vmax.f32 %v1883_v29, %v1886_v30  ;;  %v1891_v34 = vadd.f32 %v575_v31, %v1843_v5 }
 0x143   : > { %686 = vmax.xlane.f32.xlu2 %v685_v32 }
 0x146   : > { %v640_v33 = vpop.f32.mrf.mxu2 }
 0x147   : > { %v1894_v35 = vadd.f32 %v640_v33, %v1845_v6 }
 0x148   : > { %v578_v36 = vpop.f32.mrf.mxu1 }
 0x149   : > { %v688_v37 = vmax.f32 %v1891_v34, %v1894_v35  ;;  %v1899_v39 = vadd.f32 %v578_v36, %v1843_v5 }
 0x14b   : > { %689 = vmax.xlane.f32.xlu2 %v688_v37 }
 0x14e   : > { %v643_v38 = vpop.f32.mrf.mxu2 }
 0x14f   : > { %v1902_v40 = vadd.f32 %v643_v38, %v1845_v6 }
 0x150   : > { %v581_v41 = vpop.f32.mrf.mxu1 }
 0x151   : > { %v691_v42 = vmax.f32 %v1899_v39, %v1902_v40  ;;  %v1907_v44 = vadd.f32 %v581_v41, %v1843_v5 }
 0x153   : > { %692 = vmax.xlane.f32.xlu0 %v691_v42 }
 0x156   : > { %v646_v43 = vpop.f32.mrf.mxu2 }
 0x157   : > { %v1910_v45 = vadd.f32 %v646_v43, %v1845_v6 }
 0x158   : > { %v584_v46 = vpop.f32.mrf.mxu1 }
 0x159   : > { %v694_v47 = vmax.f32 %v1907_v44, %v1910_v45  ;;  %v1915_v49 = vadd.f32 %v584_v46, %v1843_v5 }
 0x15b   : > { %695 = vmax.xlane.f32.xlu1 %v694_v47 }
 0x15e   : > { %v649_v48 = vpop.f32.mrf.mxu2 }
 0x15f   : > { %v1918_v50 = vadd.f32 %v649_v48, %v1845_v6 }
 0x160   : > { %v587_v52 = vpop.f32.mrf.mxu1 }
 0x161   : > { %v697_v51 = vmax.f32 %v1915_v49, %v1918_v50  ;;  %v1923_v54 = vadd.f32 %v587_v52, %v1843_v5 }
 0x163   : > { %698 = vmax.xlane.f32.xlu2 %v697_v51 }
 0x166   : > { %v652_v53 = vpop.f32.mrf.mxu2 }
 0x167   : > { %v1926_v55 = vadd.f32 %v652_v53, %v1845_v6 }
 0x168   : > { %v590_v57 = vpop.f32.mrf.mxu1 }
 0x169   : > { %v700_v56 = vmax.f32 %v1923_v54, %v1926_v55  ;;  %v1931_v59 = vadd.f32 %v590_v57, %v1843_v5 }
 0x16b   : > { %701 = vmax.xlane.f32.xlu0 %v700_v56 }
 0x16e   : > { %v655_v58 = vpop.f32.mrf.mxu2 }
 0x16f   : > { %v1934_v60 = vadd.f32 %v655_v58, %v1845_v6 }
 0x171   : > { %v703_v61 = vmax.f32 %v1931_v59, %v1934_v60 }
 0x173   : > { %704 = vmax.xlane.f32.xlu1 %v703_v61 }
 0x176   : > { %v593_v62 = vpop.f32.mrf.mxu3  ;;  %v658_v63 = vpop.f32.mrf.mxu2 }
 0x177   : > { %v1939_v0 = vadd.f32 %v593_v62, %v1843_v5  ;;  %v1942_v1 = vadd.f32 %v658_v63, %v1845_v6 }
 0x179   : > { %v706_v2 = vmax.f32 %v1939_v0, %v1942_v1 }
 0x17b   : > { %707 = vmax.xlane.f32.xlu2 %v706_v2 }
 0x17e   : > { %v596_v3 = vpop.f32.mrf.mxu3  ;;  %v661_v4 = vpop.f32.mrf.mxu2 }
 0x17f   : > { %v1947_v7 = vadd.f32 %v596_v3, %v1843_v5  ;;  %v1950_v8 = vadd.f32 %v661_v4, %v1845_v6 }
 0x181   : > { %v709_v11 = vmax.f32 %v1947_v7, %v1950_v8 }
 0x183   : > { %710 = vmax.xlane.f32.xlu0 %v709_v11 }
 0x186   : > { %v599_v12 = vpop.f32.mrf.mxu3 }
 0x187   : > { %v1963_v28 = vadd.f32 %v599_v12, %v1843_v5 }
 0x18e   : > { %v602_v13 = vpop.f32.mrf.mxu3 }
 0x18f   : > { %v1977_v47 = vadd.f32 %v602_v13, %v1843_v5 }
 0x192   : > { %v1954_v16 = vpop.xlane.xlu0 %674 }
 0x193   : > { %v721_v18 = vsub.f32 %v1848_v9, %v1954_v16  ;;  %v722_v21 = vsub.f32 %v1851_v10, %v1954_v16 }
 0x195   : > { %v753_v22 = vmul.f32 1.442695, %v721_v18  ;;  %v755_v23 = vmul.f32 1.442695, %v722_v21 }
 0x196   : > { %v605_v17 = vpop.f32.mrf.mxu3 }
 0x197   : > { %1291 = vpow2.f32 %v753_v22  ;;  %v1989_v63 = vadd.f32 %v605_v17, %v1843_v5 }
 0x198   : > { %1293 = vpow2.f32 %v755_v23 }
 0x19a   : > { %v1960_v26 = vpop.xlane.xlu0 %677 }
 0x19b   : > { %v723_v31 = vsub.f32 %v1857_v14, %v1960_v26  ;;  %v724_v33 = vsub.f32 %v1860_v15, %v1960_v26 }
 0x19d   : > { %v757_v37 = vmul.f32 1.442695, %v723_v31  ;;  %v759_v38 = vmul.f32 1.442695, %v724_v33  ;;  %v1292_v41 = vpop.eup %1291 }
 0x19e   : > { %v664_v27 = vpop.f32.mrf.mxu3  ;;  %v1294_v42 = vpop.eup %1293 }
 0x19f   : > { %v1968_v32 = vadd.f32 %v664_v27, %v1845_v6  ;;  %1295 = vpow2.f32 %v757_v37  ;;  %v817_v56 = vadd.f32 %v1294_v42, %v1292_v41 }
 0x1a0   : > { %1297 = vpow2.f32 %v759_v38 }
 0x1a1   : > { %v712_v36 = vmax.f32 %v1963_v28, %v1968_v32 }
 0x1a3   : > { %713 = vmax.xlane.f32.xlu1 %v712_v36 }
 0x1a5   : > { %v1296_v61 = vpop.eup %1295 }
 0x1a6   : > { %v1974_v43 = vpop.xlane.xlu1 %680  ;;  %v667_v46 = vpop.f32.mrf.mxu3 }
 0x1a7   : > { %v725_v48 = vsub.f32 %v1867_v19, %v1974_v43  ;;  %v1982_v51 = vadd.f32 %v667_v46, %v1845_v6  ;;  %v726_v52 = vsub.f32 %v1870_v20, %v1974_v43  ;;  %v1298_v62 = vpop.eup %1297 }
 0x1a8   : > { %v820_v21 = vadd.f32 %v1298_v62, %v1296_v61 }
 0x1a9   : > { %v715_v53 = vmax.f32 %v1977_v47, %v1982_v51  ;;  %v761_v57 = vmul.f32 1.442695, %v725_v48  ;;  %v763_v58 = vmul.f32 1.442695, %v726_v52 }
 0x1ab   : > { %716 = vmax.xlane.f32.xlu2 %v715_v53  ;;  %818 = vadd.xlane.f32.xlu1 %v817_v56  ;;  %1299 = vpow2.f32 %v761_v57 }
 0x1ac   : > { %1301 = vpow2.f32 %v763_v58 }
 0x1ae   : > { %v1991_v2 = vpop.xlane.xlu1 %683  ;;  %v670_v3 = vpop.f32.mrf.mxu3 }
 0x1af   : > { %v727_v4 = vsub.f32 %v1875_v24, %v1991_v2  ;;  %v728_v11 = vsub.f32 %v1878_v25, %v1991_v2  ;;  %v1998_v12 = vadd.f32 %v670_v3, %v1845_v6 }
 0x1b1   : > { %v765_v13 = vmul.f32 1.442695, %v727_v4  ;;  %v767_v18 = vmul.f32 1.442695, %v728_v11  ;;  %v718_v5 = vmax.f32 %v1989_v63, %v1998_v12  ;;  %v1300_v17 = vpop.eup %1299 }
 0x1b2   : > { %v1302_v22 = vpop.eup %1301 }
 0x1b3   : > { %1303 = vpow2.f32 %v765_v13  ;;  %821 = vadd.xlane.f32.xlu2 %v820_v21  ;;  %719 = vmax.xlane.f32.xlu0 %v718_v5  ;;  %v823_v37 = vadd.f32 %v1302_v22, %v1300_v17 }
 0x1b4   : > { %1305 = vpow2.f32 %v767_v18 }
 0x1b6   : > { %v2002_v23 = vpop.xlane.xlu2 %686 }
 0x1b7   : > { %v729_v27 = vsub.f32 %v1883_v29, %v2002_v23  ;;  %v730_v6 = vsub.f32 %v1886_v30, %v2002_v23 }
 0x1b9   : > { %v1304_v31 = vpop.eup %1303  ;;  %v769_v33 = vmul.f32 1.442695, %v729_v27  ;;  %v771_v36 = vmul.f32 1.442695, %v730_v6 }
 0x1ba   : > { %v1306_v38 = vpop.eup %1305 }
 0x1bb   : > { %1307 = vpow2.f32 %v769_v33  ;;  %824 = vadd.xlane.f32.xlu0 %v823_v37  ;;  %v826_v41 = vadd.f32 %v1306_v38, %v1304_v31 }
 0x1bc   : > { %1309 = vpow2.f32 %v771_v36 }
 0x1bd   : > { %827 = vadd.xlane.f32.xlu1 %v826_v41 }
 0x1be   : > { %v2008_v42 = vpop.xlane.xlu2 %689 }
 0x1bf   : > { %v731_v46 = vsub.f32 %v1891_v34, %v2008_v42  ;;  %v732_v48 = vsub.f32 %v1894_v35, %v2008_v42 }
 0x1c1   : > { %v1308_v52 = vpop.eup %1307  ;;  %v773_v53 = vmul.f32 1.442695, %v731_v46  ;;  %v775_v56 = vmul.f32 1.442695, %v732_v48 }
 0x1c2   : > { %v1310_v57 = vpop.eup %1309 }
 0x1c3   : > { %1311 = vpow2.f32 %v773_v53  ;;  %v829_v58 = vadd.f32 %v1310_v57, %v1308_v52 }
 0x1c4   : > { %1313 = vpow2.f32 %v775_v56 }
 0x1c5   : > { %830 = vadd.xlane.f32.xlu2 %v829_v58 }
 0x1c6   : > { %v2014_v61 = vpop.xlane.xlu0 %692 }
 0x1c7   : > { %v733_v62 = vsub.f32 %v1899_v39, %v2014_v61  ;;  %v734_v3 = vsub.f32 %v1902_v40, %v2014_v61 }
 0x1c9   : > { %v1312_v4 = vpop.eup %1311  ;;  %v777_v11 = vmul.f32 1.442695, %v733_v62  ;;  %v779_v13 = vmul.f32 1.442695, %v734_v3 }
 0x1ca   : > { %v1314_v18 = vpop.eup %1313 }
 0x1cb   : > { %1315 = vpow2.f32 %v777_v11  ;;  %v832_v21 = vadd.f32 %v1314_v18, %v1312_v4 }
 0x1cc   : > { %1317 = vpow2.f32 %v779_v13 }
 0x1cd   : > { %833 = vadd.xlane.f32.xlu0 %v832_v21 }
 0x1ce   : > { %v2020_v5 = vpop.xlane.xlu1 %695 }
 0x1cf   : > { %v735_v17 = vsub.f32 %v1907_v44, %v2020_v5  ;;  %v736_v22 = vsub.f32 %v1910_v45, %v2020_v5 }
 0x1d1   : > { %v1316_v27 = vpop.eup %1315  ;;  %v781_v6 = vmul.f32 1.442695, %v735_v17  ;;  %v783_v31 = vmul.f32 1.442695, %v736_v22 }
 0x1d2   : > { %v1318_v33 = vpop.eup %1317 }
 0x1d3   : > { %1319 = vpow2.f32 %v781_v6  ;;  %v835_v36 = vadd.f32 %v1318_v33, %v1316_v27 }
 0x1d4   : > { %1321 = vpow2.f32 %v783_v31 }
 0x1d5   : > { %836 = vadd.xlane.f32.xlu1 %v835_v36 }
 0x1d6   : > { %v2026_v37 = vpop.xlane.xlu2 %698 }
 0x1d7   : > { %v737_v38 = vsub.f32 %v1915_v49, %v2026_v37  ;;  %v738_v41 = vsub.f32 %v1918_v50, %v2026_v37 }
 0x1d9   : > { %v1320_v46 = vpop.eup %1319  ;;  %v785_v48 = vmul.f32 1.442695, %v737_v38  ;;  %v787_v52 = vmul.f32 1.442695, %v738_v41 }
 0x1da   : > { %v1322_v53 = vpop.eup %1321 }
 0x1db   : > { %1323 = vpow2.f32 %v785_v48  ;;  %v838_v56 = vadd.f32 %v1322_v53, %v1320_v46 }
 0x1dc   : > { %1325 = vpow2.f32 %v787_v52 }
 0x1dd   : > { %839 = vadd.xlane.f32.xlu2 %v838_v56 }
 0x1de   : > { %v2032_v57 = vpop.xlane.xlu0 %701 }
 0x1df   : > { %v739_v58 = vsub.f32 %v1923_v54, %v2032_v57  ;;  %v740_v62 = vsub.f32 %v1926_v55, %v2032_v57 }
 0x1e1   : > { %v1324_v3 = vpop.eup %1323  ;;  %v789_v4 = vmul.f32 1.442695, %v739_v58  ;;  %v791_v11 = vmul.f32 1.442695, %v740_v62 }
 0x1e2   : > { %v1326_v13 = vpop.eup %1325 }
 0x1e3   : > { %1327 = vpow2.f32 %v789_v4  ;;  %v841_v18 = vadd.f32 %v1326_v13, %v1324_v3 }
 0x1e4   : > { %1329 = vpow2.f32 %v791_v11 }
 0x1e5   : > { %842 = vadd.xlane.f32.xlu0 %v841_v18 }
 0x1e6   : > { %v2038_v21 = vpop.xlane.xlu1 %704 }
 0x1e7   : > { %v741_v17 = vsub.f32 %v1931_v59, %v2038_v21  ;;  %v742_v22 = vsub.f32 %v1934_v60, %v2038_v21 }
 0x1e9   : > { %v1328_v27 = vpop.eup %1327  ;;  %v793_v6 = vmul.f32 1.442695, %v741_v17  ;;  %v795_v31 = vmul.f32 1.442695, %v742_v22 }
 0x1ea   : > { %v1330_v33 = vpop.eup %1329 }
 0x1eb   : > { %1331 = vpow2.f32 %v793_v6  ;;  %v844_v36 = vadd.f32 %v1330_v33, %v1328_v27 }
 0x1ec   : > { %1333 = vpow2.f32 %v795_v31 }
 0x1ed   : > { %845 = vadd.xlane.f32.xlu1 %v844_v36 }
 0x1ee   : > { %v2044_v38 = vpop.xlane.xlu2 %707 }
 0x1ef   : > { %v743_v41 = vsub.f32 %v1939_v0, %v2044_v38  ;;  %v744_v46 = vsub.f32 %v1942_v1, %v2044_v38 }
 0x1f1   : > { %v1332_v48 = vpop.eup %1331  ;;  %v797_v52 = vmul.f32 1.442695, %v743_v41  ;;  %v799_v53 = vmul.f32 1.442695, %v744_v46 }
 0x1f2   : > { %v1334_v56 = vpop.eup %1333 }
 0x1f3   : > { %1335 = vpow2.f32 %v797_v52  ;;  %v847_v58 = vadd.f32 %v1334_v56, %v1332_v48 }
 0x1f4   : > { %1337 = vpow2.f32 %v799_v53 }
 0x1f5   : > { %848 = vadd.xlane.f32.xlu2 %v847_v58 }
 0x1f6   : > { %v2050_v62 = vpop.xlane.xlu0 %710 }
 0x1f7   : > { %v745_v3 = vsub.f32 %v1947_v7, %v2050_v62  ;;  %v746_v4 = vsub.f32 %v1950_v8, %v2050_v62 }
 0x1f9   : > { %v1336_v11 = vpop.eup %1335  ;;  %v801_v13 = vmul.f32 1.442695, %v745_v3  ;;  %v803_v18 = vmul.f32 1.442695, %v746_v4 }
 0x1fa   : > { %v1338_v17 = vpop.eup %1337 }
 0x1fb   : > { %1339 = vpow2.f32 %v801_v13  ;;  %v850_v22 = vadd.f32 %v1338_v17, %v1336_v11 }
 0x1fc   : > { %1341 = vpow2.f32 %v803_v18  ;;  %v2068_v18 = vstv %s897_s24 }
 0x1fd   : > { %851 = vadd.xlane.f32.xlu0 %v850_v22 }
 0x201   : > { %v1340_v27 = vpop.eup %1339 }
 0x202   : > { %v1342_v6 = vpop.eup %1341 }
 0x203   : > { %v853_v31 = vadd.f32 %v1342_v6, %v1340_v27  ;;  %v899_v27 = vadd.f32 %v2068_v18, %v1954_v16  ;;  %v1451_v16 = vmov 0.0  }
 0x205   : > { %854 = vadd.xlane.f32.xlu1 %v853_v31 }
 0x216   : > { %v2056_v33 = vpop.xlane.xlu1 %713 }
 0x217   : > { %v747_v36 = vsub.f32 %v1963_v28, %v2056_v33  ;;  %v748_v41 = vsub.f32 %v1968_v32, %v2056_v33 }
 0x219   : > { %v805_v46 = vmul.f32 1.442695, %v747_v36  ;;  %v807_v48 = vmul.f32 1.442695, %v748_v41 }
 0x21b   : > { %1343 = vpow2.f32 %v805_v46 }
 0x21c   : > { %1345 = vpow2.f32 %v807_v48 }
 0x21e   : > { %v2062_v52 = vpop.xlane.xlu2 %716  ;;  %v819_v53 = vpop.xlane.xlu1 %818 }
 0x21f   : > { %v749_v56 = vsub.f32 %v1977_v47, %v2062_v52  ;;  %v750_v58 = vsub.f32 %v1982_v51, %v2062_v52  ;;  %1347 = vlog2.f32 %v819_v53 }
 0x221   : > { %v1344_v3 = vpop.eup %1343  ;;  %v809_v4 = vmul.f32 1.442695, %v749_v56  ;;  %v811_v11 = vmul.f32 1.442695, %v750_v58 }
 0x222   : > { %v1346_v13 = vpop.eup %1345 }
 0x223   : > { %1349 = vpow2.f32 %v809_v4  ;;  %v856_v17 = vadd.f32 %v1346_v13, %v1344_v3 }
 0x224   : > { %1351 = vpow2.f32 %v811_v11 }
 0x225   : > { %v1348_v22 = vpop.eup %1347  ;;  %857 = vadd.xlane.f32.xlu2 %v856_v17 }
 0x226   : > { %v866_v6 = vmul.f32 0.6931472, %v1348_v22  ;;  %v822_v31 = vpop.xlane.xlu2 %821  ;;  %v2075_v36 = vpop.xlane.xlu0 %719 }
 0x227   : > { %1353 = vlog2.f32 %v822_v31  ;;  %v751_v41 = vsub.f32 %v1989_v63, %v2075_v36  ;;  %v752_v46 = vsub.f32 %v1998_v12, %v2075_v36 }
 0x228   : > { %v915_v48 = vadd.f32 %v899_v27, %v866_v6 }
 0x229   : > { %v1350_v53 = vpop.eup %1349  ;;  %v813_v56 = vmul.f32 1.442695, %v751_v41  ;;  %v815_v58 = vmul.f32 1.442695, %v752_v46 }
 0x22a   : > { %v1352_v3 = vpop.eup %1351  ;;  %vm931_vm1 = vcmp.ge.f32.partialorder %v1848_v9, %v915_v48  ;;  %vm932_vm2 = vcmp.ge.f32.partialorder %v1851_v10, %v915_v48  ;;  %v900_v9 = vadd.f32 %v2068_v18, %v1960_v26 }
 0x22b   : > { %v963_v4 = vsel %vm931_vm1, 1.0, %v1451_v16  ;;  %v964_v11 = vsel %vm932_vm2, 1.0, %v1451_v16  ;;  %1355 = vpow2.f32 %v813_v56  ;;  %v859_v13 = vadd.f32 %v1352_v3, %v1350_v53 }
 0x22c   : > { %995 = vst [vmem:[%s2085_s6] sm:$0xff] %v963_v4  ;;  %1357 = vpow2.f32 %v815_v58  ;;  %v901_v56 = vadd.f32 %v2068_v18, %v1974_v43 }
 0x22d   : > { %v1354_v17 = vpop.eup %1353  ;;  %996 = vst [vmem:[%s2085_s6 + $0x8] sm:$0xff] %v964_v11  ;;  %860 = vadd.xlane.f32.xlu0 %v859_v13 }
 0x22e   : > { %v868_v10 = vmul.f32 0.6931472, %v1354_v17  ;;  %v825_v22 = vpop.xlane.xlu0 %824 }
 0x22f   : > { %1359 = vlog2.f32 %v825_v22 }
 0x230   : > { %v916_v27 = vadd.f32 %v900_v9, %v868_v10  ;;  %v828_v6 = vpop.xlane.xlu1 %827 }
 0x231   : > { %v1356_v31 = vpop.eup %1355  ;;  %1361 = vlog2.f32 %v828_v6 }
 0x232   : > { %v1358_v41 = vpop.eup %1357  ;;  %vm933_vm3 = vcmp.ge.f32.partialorder %v1857_v14, %v916_v27  ;;  %vm934_vm4 = vcmp.ge.f32.partialorder %v1860_v15, %v916_v27  ;;  %v902_v14 = vadd.f32 %v2068_v18, %v1991_v2 }
 0x233   : > { %v965_v46 = vsel %vm933_vm3, 1.0, %v1451_v16  ;;  %v966_v48 = vsel %vm934_vm4, 1.0, %v1451_v16  ;;  %v862_v53 = vadd.f32 %v1358_v41, %v1356_v31 }
 0x234   : > { %997 = vst [vmem:[%s2085_s6 + $0x10] sm:$0xff] %v965_v46 }
 0x235   : > { %v1360_v26 = vpop.eup %1359  ;;  %998 = vst [vmem:[%s2085_s6 + $0x18] sm:$0xff] %v966_v48  ;;  %863 = vadd.xlane.f32.xlu1 %v862_v53 }
 0x236   : > { %v870_v58 = vmul.f32 0.6931472, %v1360_v26 }
 0x237   : > { %v1362_v3 = vpop.eup %1361 }
 0x238   : > { %v917_v15 = vadd.f32 %v901_v56, %v870_v58  ;;  %v872_v4 = vmul.f32 0.6931472, %v1362_v3  ;;  %v831_v11 = vpop.xlane.xlu2 %830 }
 0x239   : > { %1363 = vlog2.f32 %v831_v11 }
 0x23a   : > { %vm935_vm5 = vcmp.ge.f32.partialorder %v1867_v19, %v917_v15  ;;  %vm936_vm6 = vcmp.ge.f32.partialorder %v1870_v20, %v917_v15  ;;  %v918_v13 = vadd.f32 %v902_v14, %v872_v4  ;;  %v903_v20 = vadd.f32 %v2068_v18, %v2002_v23 }
 0x23b   : > { %v967_v17 = vsel %vm935_vm5, 1.0, %v1451_v16  ;;  %v968_v43 = vsel %vm936_vm6, 1.0, %v1451_v16  ;;  %v904_v23 = vadd.f32 %v2068_v18, %v2008_v42  ;;  %v905_v42 = vadd.f32 %v2068_v18, %v2014_v61 }
 0x23c   : > { %999 = vst [vmem:[%s2085_s6 + $0x20] sm:$0xff] %v967_v17  ;;  %vm937_vm7 = vcmp.ge.f32.partialorder %v1875_v24, %v918_v13  ;;  %vm938_vm8 = vcmp.ge.f32.partialorder %v1878_v25, %v918_v13  ;;  %v906_v61 = vadd.f32 %v2068_v18, %v2020_v5  ;;  %v907_v5 = vadd.f32 %v2068_v18, %v2026_v37 }
 0x23d   : > { %1000 = vst [vmem:[%s2085_s6 + $0x28] sm:$0xff] %v968_v43  ;;  %v969_v2 = vsel %vm937_vm7, 1.0, %v1451_v16  ;;  %v970_v9 = vsel %vm938_vm8, 1.0, %v1451_v16  ;;  %v908_v37 = vadd.f32 %v2068_v18, %v2032_v57  ;;  %v909_v57 = vadd.f32 %v2068_v18, %v2038_v21 }
 0x23e   : > { %1001 = vst [vmem:[%s2085_s6 + $0x30] sm:$0xff] %v969_v2  ;;  %v910_v21 = vadd.f32 %v2068_v18, %v2044_v38  ;;  %v911_v38 = vadd.f32 %v2068_v18, %v2050_v62  ;;  %v912_v62 = vadd.f32 %v2068_v18, %v2056_v33  ;;  %v913_v33 = vadd.f32 %v2068_v18, %v2062_v52 }
 0x23f   : > { %v1364_v19 = vpop.eup %1363  ;;  %1002 = vst [vmem:[%s2085_s6 + $0x38] sm:$0xff] %v970_v9 }
 0x240   : > { %v874_v10 = vmul.f32 0.6931472, %v1364_v19  ;;  %v834_v22 = vpop.xlane.xlu0 %833 }
 0x241   : > { %1365 = vlog2.f32 %v834_v22 }
 0x242   : > { %v919_v27 = vadd.f32 %v903_v20, %v874_v10 }
 0x244   : > { %vm939_vm9 = vcmp.ge.f32.partialorder %v1883_v29, %v919_v27  ;;  %vm940_vm10 = vcmp.ge.f32.partialorder %v1886_v30, %v919_v27 }
 0x245   : > { %v971_v24 = vsel %vm939_vm9, 1.0, %v1451_v16  ;;  %v972_v25 = vsel %vm940_vm10, 1.0, %v1451_v16 }
 0x246   : > { %1003 = vst [vmem:[%s2085_s6 + $0x40] sm:$0xff] %v971_v24 }
 0x247   : > { %v1366_v6 = vpop.eup %1365  ;;  %1004 = vst [vmem:[%s2085_s6 + $0x48] sm:$0xff] %v972_v25 }
 0x248   : > { %v876_v31 = vmul.f32 0.6931472, %v1366_v6  ;;  %v837_v41 = vpop.xlane.xlu1 %836 }
 0x249   : > { %1367 = vlog2.f32 %v837_v41 }
 0x24a   : > { %v920_v46 = vadd.f32 %v904_v23, %v876_v31 }
 0x24c   : > { %vm941_vm11 = vcmp.ge.f32.partialorder %v1891_v34, %v920_v46  ;;  %vm942_vm12 = vcmp.ge.f32.partialorder %v1894_v35, %v920_v46 }
 0x24d   : > { %v973_v29 = vsel %vm941_vm11, 1.0, %v1451_v16  ;;  %v974_v30 = vsel %vm942_vm12, 1.0, %v1451_v16 }
 0x24e   : > { %1005 = vst [vmem:[%s2085_s6 + $0x50] sm:$0xff] %v973_v29 }
 0x24f   : > { %v1368_v48 = vpop.eup %1367  ;;  %1006 = vst [vmem:[%s2085_s6 + $0x58] sm:$0xff] %v974_v30 }
 0x250   : > { %v878_v53 = vmul.f32 0.6931472, %v1368_v48  ;;  %v840_v26 = vpop.xlane.xlu2 %839 }
 0x251   : > { %1369 = vlog2.f32 %v840_v26 }
 0x252   : > { %v921_v56 = vadd.f32 %v905_v42, %v878_v53 }
 0x254   : > { %vm943_vm13 = vcmp.ge.f32.partialorder %v1899_v39, %v921_v56  ;;  %vm944_vm14 = vcmp.ge.f32.partialorder %v1902_v40, %v921_v56 }
 0x255   : > { %v975_v34 = vsel %vm943_vm13, 1.0, %v1451_v16  ;;  %v976_v35 = vsel %vm944_vm14, 1.0, %v1451_v16 }
 0x256   : > { %1007 = vst [vmem:[%s2085_s6 + $0x60] sm:$0xff] %v975_v34 }
 0x257   : > { %v1370_v58 = vpop.eup %1369  ;;  %1008 = vst [vmem:[%s2085_s6 + $0x68] sm:$0xff] %v976_v35 }
 0x258   : > { %v880_v3 = vmul.f32 0.6931472, %v1370_v58  ;;  %v843_v14 = vpop.xlane.xlu0 %842  ;;  %v914_v58 = vadd.f32 %v2068_v18, %v2075_v36 }
 0x259   : > { %1371 = vlog2.f32 %v843_v14 }
 0x25a   : > { %v922_v15 = vadd.f32 %v906_v61, %v880_v3 }
 0x25c   : > { %vm945_vm15 = vcmp.ge.f32.partialorder %v1907_v44, %v922_v15  ;;  %vm946_vm0 = vcmp.ge.f32.partialorder %v1910_v45, %v922_v15 }
 0x25d   : > { %v977_v39 = vsel %vm945_vm15, 1.0, %v1451_v16  ;;  %v978_v40 = vsel %vm946_vm0, 1.0, %v1451_v16 }
 0x25e   : > { %1009 = vst [vmem:[%s2085_s6 + $0x70] sm:$0xff] %v977_v39 }
 0x25f   : > { %v1372_v4 = vpop.eup %1371  ;;  %1010 = vst [vmem:[%s2085_s6 + $0x78] sm:$0xff] %v978_v40 }
 0x260   : > { %v882_v11 = vmul.f32 0.6931472, %v1372_v4  ;;  %v846_v13 = vpop.xlane.xlu1 %845 }
 0x261   : > { %1373 = vlog2.f32 %v846_v13 }
 0x262   : > { %v923_v17 = vadd.f32 %v907_v5, %v882_v11 }
 0x264   : > { %vm947_vm1 = vcmp.ge.f32.partialorder %v1915_v49, %v923_v17  ;;  %vm948_vm2 = vcmp.ge.f32.partialorder %v1918_v50, %v923_v17 }
 0x265   : > { %v979_v44 = vsel %vm947_vm1, 1.0, %v1451_v16  ;;  %v980_v45 = vsel %vm948_vm2, 1.0, %v1451_v16 }
 0x266   : > { %1011 = vst [vmem:[%s2085_s6 + $0x80] sm:$0xff] %v979_v44 }
 0x267   : > { %v1374_v43 = vpop.eup %1373  ;;  %1012 = vst [vmem:[%s2085_s6 + $0x88] sm:$0xff] %v980_v45 }
 0x268   : > { %v884_v2 = vmul.f32 0.6931472, %v1374_v43  ;;  %v849_v9 = vpop.xlane.xlu2 %848 }
 0x269   : > { %1375 = vlog2.f32 %v849_v9 }
 0x26a   : > { %v924_v19 = vadd.f32 %v908_v37, %v884_v2 }
 0x26c   : > { %vm949_vm3 = vcmp.ge.f32.partialorder %v1923_v54, %v924_v19  ;;  %vm950_vm4 = vcmp.ge.f32.partialorder %v1926_v55, %v924_v19 }
 0x26d   : > { %v981_v49 = vsel %vm949_vm3, 1.0, %v1451_v16  ;;  %v982_v50 = vsel %vm950_vm4, 1.0, %v1451_v16 }
 0x26e   : > { %1013 = vst [vmem:[%s2085_s6 + $0x90] sm:$0xff] %v981_v49 }
 0x26f   : > { %v1376_v20 = vpop.eup %1375  ;;  %1014 = vst [vmem:[%s2085_s6 + $0x98] sm:$0xff] %v982_v50 }
 0x270   : > { %v886_v10 = vmul.f32 0.6931472, %v1376_v20  ;;  %v852_v22 = vpop.xlane.xlu0 %851 }
 0x271   : > { %1377 = vlog2.f32 %v852_v22 }
 0x272   : > { %v925_v27 = vadd.f32 %v909_v57, %v886_v10 }
 0x274   : > { %vm951_vm5 = vcmp.ge.f32.partialorder %v1931_v59, %v925_v27  ;;  %vm952_vm6 = vcmp.ge.f32.partialorder %v1934_v60, %v925_v27 }
 0x275   : > { %v983_v54 = vsel %vm951_vm5, 1.0, %v1451_v16  ;;  %v984_v55 = vsel %vm952_vm6, 1.0, %v1451_v16 }
 0x276   : > { %1015 = vst [vmem:[%s2085_s6 + $0xa0] sm:$0xff] %v983_v54 }
 0x277   : > { %v1378_v24 = vpop.eup %1377  ;;  %1016 = vst [vmem:[%s2085_s6 + $0xa8] sm:$0xff] %v984_v55 }
 0x278   : > { %v888_v25 = vmul.f32 0.6931472, %v1378_v24  ;;  %v855_v6 = vpop.xlane.xlu1 %854 }
 0x279   : > { %1379 = vlog2.f32 %v855_v6 }
 0x27a   : > { %v926_v23 = vadd.f32 %v910_v21, %v888_v25 }
 0x27c   : > { %vm953_vm7 = vcmp.ge.f32.partialorder %v1939_v0, %v926_v23  ;;  %vm954_vm8 = vcmp.ge.f32.partialorder %v1942_v1, %v926_v23 }
 0x27d   : > { %v985_v59 = vsel %vm953_vm7, 1.0, %v1451_v16  ;;  %v986_v60 = vsel %vm954_vm8, 1.0, %v1451_v16 }
 0x27e   : > { %1017 = vst [vmem:[%s2085_s6 + $0xb0] sm:$0xff] %v985_v59 }
 0x27f   : > { %v1380_v31 = vpop.eup %1379  ;;  %1018 = vst [vmem:[%s2085_s6 + $0xb8] sm:$0xff] %v986_v60 }
 0x280   : > { %v890_v41 = vmul.f32 0.6931472, %v1380_v31 }
 0x282   : > { %v927_v46 = vadd.f32 %v911_v38, %v890_v41 }
 0x284   : > { %vm955_vm9 = vcmp.ge.f32.partialorder %v1947_v7, %v927_v46  ;;  %vm956_vm10 = vcmp.ge.f32.partialorder %v1950_v8, %v927_v46 }
 0x285   : > { %v987_v0 = vsel %vm955_vm9, 1.0, %v1451_v16  ;;  %v988_v1 = vsel %vm956_vm10, 1.0, %v1451_v16 }
 0x286   : > { %1019 = vst [vmem:[%s2085_s6 + $0xc0] sm:$0xff] %v987_v0 }
 0x287   : > { %1020 = vst [vmem:[%s2085_s6 + $0xc8] sm:$0xff] %v988_v1 }
 0x298   : > { %v858_v29 = vpop.xlane.xlu2 %857 }
 0x299   : > { %1381 = vlog2.f32 %v858_v29 }
 0x29f   : > { %v1382_v30 = vpop.eup %1381 }
 0x2a0   : > { %v892_v48 = vmul.f32 0.6931472, %v1382_v30  ;;  %v861_v42 = vpop.xlane.xlu0 %860 }
 0x2a1   : > { %1383 = vlog2.f32 %v861_v42 }
 0x2a2   : > { %v928_v7 = vadd.f32 %v912_v62, %v892_v48 }
 0x2a4   : > { %vm957_vm11 = vcmp.ge.f32.partialorder %v1963_v28, %v928_v7  ;;  %vm958_vm12 = vcmp.ge.f32.partialorder %v1968_v32, %v928_v7 }
 0x2a5   : > { %v989_v8 = vsel %vm957_vm11, 1.0, %v1451_v16  ;;  %v990_v53 = vsel %vm958_vm12, 1.0, %v1451_v16 }
 0x2a6   : > { %1021 = vst [vmem:[%s2085_s6 + $0xd0] sm:$0xff] %v989_v8 }
 0x2a7   : > { %v1384_v26 = vpop.eup %1383  ;;  %1022 = vst [vmem:[%s2085_s6 + $0xd8] sm:$0xff] %v990_v53 }
 0x2a8   : > { %v894_v56 = vmul.f32 0.6931472, %v1384_v26  ;;  %v864_v34 = vpop.xlane.xlu1 %863 }
 0x2a9   : > { %1385 = vlog2.f32 %v864_v34 }
 0x2aa   : > { %v929_v35 = vadd.f32 %v913_v33, %v894_v56 }
 0x2ac   : > { %vm959_vm13 = vcmp.ge.f32.partialorder %v1977_v47, %v929_v35  ;;  %vm960_vm14 = vcmp.ge.f32.partialorder %v1982_v51, %v929_v35 }
 0x2ad   : > { %v991_v28 = vsel %vm959_vm13, 1.0, %v1451_v16  ;;  %v992_v32 = vsel %vm960_vm14, 1.0, %v1451_v16 }
 0x2ae   : > { %1023 = vst [vmem:[%s2085_s6 + $0xe0] sm:$0xff] %v991_v28 }
 0x2af   : > { %v1386_v52 = vpop.eup %1385  ;;  %1024 = vst [vmem:[%s2085_s6 + $0xe8] sm:$0xff] %v992_v32 }
 0x2b0   : > { %v896_v47 = vmul.f32 0.6931472, %v1386_v52 }
 0x2b2   : > { %v930_v51 = vadd.f32 %v914_v58, %v896_v47 }
 0x2b4   : > { %vm961_vm15 = vcmp.ge.f32.partialorder %v1989_v63, %v930_v51  ;;  %vm962_vm0 = vcmp.ge.f32.partialorder %v1998_v12, %v930_v51 }
 0x2b5   : > { %v993_v61 = vsel %vm961_vm15, 1.0, %v1451_v16  ;;  %v994_v3 = vsel %vm962_vm0, 1.0, %v1451_v16 }
 0x2b6   : > { %1025 = vst [vmem:[%s2085_s6 + $0xf0] sm:$0xff] %v993_v61 }
 0x2b7   : > { %1026 = vst [vmem:[%s2085_s6 + $0xf8] sm:$0xff] %v994_v3 }
 0x2b8   : > { %1414 = shalt.err (!%p1411_p3)
}
 0x2b9   : > { %s1452_s24 = smov 256   ;;  %s1453_s26 = smov 16  }
 0x2ba   : > { %1249 = dma.vmem_to_hbm [thread:$0]  (%p1525_p5), %s1042_s4, 4096, %s1044_s11, %s1028_s12, %s1452_s24, %s1452_s24, %s1453_s26  }
 0x2bb PF: > { %p1255_p4 = scmp.ge.s32.totalorder %s1449_s23, 2  ;;  %s1058_s27 = sand.u32 1, %s1437_s20  }
 0x2bc   : > { %s1059_s6 = scalar_lea.sflag [#allocation4], %s1058_s27 }
 0x2bd   : > { %p1252_p7 = pnand %p1255_p4, %p1529_p6 }
 0x2bf   : > { %p1253_p8 = pneg %p1252_p7 }
 0x2c1   : > { %1432 = dma.done.wait (%p1253_p8), %s1059_s6, 4096  }
 0x2c2   : > { %1434 = vsyncadd (%p1253_p8), %s1059_s6, 4294963200  ;;  %p16_p9 = scmp.ge.s32.totalorder %s1512_s25, 4   ;;  %s2251_s20 = smov %s1441_s21 }
 0x2c3   : > { %s2252_s21 = smov %s1445_s22  ;;  %s2253_s22 = smov %s1523_s28 }
 0x2c4   : > { %s2254_s23 = smov %s1512_s25  ;;  %18 = sbr.rel (!%p16_p9) target bundleno = 5 (0x5), region = 75 }
 0x2c9   :  { %1065 = vsyncpa [#allocation4], 1 }
 0x2ca   :  { %1067 = vsyncpa [#allocation4 + $0x1], 1 }

</bundles_post_ra>
